<compile_context>
chip_gen: v5e
topology: v5e:2x2
jax: 0.10.0
libtpu: 0.0.40
codegen_flags: <defaults>
</compile_context>

<pallas_src>
import jax
import jax.numpy as jnp
from jax.experimental import pallas as pl
from jax.experimental.pallas import tpu as pltpu


def conv_bn_leaky_kernel(xt_ref, w_ref, shift_ref, o_ref):
    """One (batch, H-tile) per grid step.

    xt_ref   : (TH+2, W+2, Cin_p)   bf16, spatially pre-padded input tile (2-row halo)
    w_ref    : (9*Cin_p, Cout_p)    bf16, conv weights with BN scale folded in
    shift_ref: (1, Cout_p)          f32, folded BN shift (includes conv bias)
    o_ref    : (TH, W, Cout_p)      f32 output tile
    """
    TH, W, Cout_p = o_ref.shape
    Cin_p = xt_ref.shape[-1]

    # im2col: concatenate the 9 shifted views along the (lane) channel axis, one reshape.
    parts = []
    for kh in range(3):
        for kw in range(3):
            parts.append(xt_ref[kh:kh + TH, kw:kw + W, :])          # (TH, W, Cin_p)
    pmat = jnp.concatenate(parts, axis=-1).reshape(TH * W, 9 * Cin_p)

    # Single MXU GEMM, f32 accumulation.
    acc = jnp.dot(pmat, w_ref[...], preferred_element_type=jnp.float32)  # (TH*W, Cout_p)

    # Folded BatchNorm shift (+ conv bias), then LeakyReLU(0.1).
    y = acc + shift_ref[...]
    y = jnp.where(y > 0, y, 0.1 * y)
    o_ref[...] = y.reshape(TH, W, Cout_p).astype(o_ref.dtype)


def conv_layer_forward(x_nchw, w_oihw, conv_bias, gamma, beta,
                       running_mean, running_var, eps=1e-4, tile_h=None):
    """Equivalent of ConvLayer.forward (k=3, stride=1, pad=1, bn=True, 'leaky'),
    with BatchNorm in inference mode. Input/Output are NCHW like PyTorch."""
    N, Cin, H, W = x_nchw.shape
    Cout = w_oihw.shape[0]

    LANE = 128
    # NOTE: on v6e/v7x, if the real channel counts are already large, pad to 256 multiples
    # instead to fully feed the 2x256x256 MXU.
    Cin_p = ((Cin + LANE - 1) // LANE) * LANE
    Cout_p = ((Cout + LANE - 1) // LANE) * LANE

    if tile_h is None:
        tile_h = max(1, min(H, max(8, 256 // max(W, 1))))   # target M = TH*W ~ 256 rows
    TH = int(tile_h)
    HT = -(-H // TH)                 # number of H tiles
    H_pad = HT * TH

    # ---- glue (plain JAX): BN fold, weight layout, channel padding ----
    inv_std = 1.0 / jnp.sqrt(running_var.astype(jnp.float32) + eps)
    scale = gamma.astype(jnp.float32) * inv_std                               # (Cout,)
    shift = beta.astype(jnp.float32) + \
        (conv_bias.astype(jnp.float32) - running_mean.astype(jnp.float32)) * scale

    # OIHW -> HWIO, fold BN scale into weights, zero-pad channels, bf16, flatten to K=9*Cin_p.
    w_hwio = jnp.transpose(w_oihw, (2, 3, 1, 0)).astype(jnp.float32) * scale[None, None, None, :]
    w_pad = jnp.zeros((3, 3, Cin_p, Cout_p), jnp.float32).at[:, :, :Cin, :Cout].set(w_hwio)
    w2 = w_pad.reshape(9 * Cin_p, Cout_p).astype(jnp.bfloat16)                # (9*Cin_p, Cout_p)

    shift2 = jnp.zeros((1, Cout_p), jnp.float32).at[0, :Cout].set(shift)

    # Input: NCHW -> NHWC, bf16, zero-pad (1px halo + H remainder + channel lanes).
    x_nhwc = jnp.transpose(x_nchw, (0, 2, 3, 1)).astype(jnp.bfloat16)
    x_pad = jnp.pad(x_nhwc, ((0, 0),
                             (1, 1 + (H_pad - H)),
                             (1, 1),
                             (0, Cin_p - Cin)))                               # (N, H_pad+2, W+2, Cin_p)

    # Overlapping H tiles with a 2-row halo (built once in the wrapper -> plain Blocked specs).
    row_idx = jnp.arange(HT)[:, None] * TH + jnp.arange(TH + 2)[None, :]      # (HT, TH+2)
    x_tiles = x_pad[:, row_idx]                                               # (N, HT, TH+2, W+2, Cin_p)

    # VMEM budget: double-buffered in/out tiles + resident weights + in-kernel im2col scratch.
    in_tile_b = (TH + 2) * (W + 2) * Cin_p * 2
    out_tile_b = TH * W * Cout_p * 4
    w_b = 9 * Cin_p * Cout_p * 2 + Cout_p * 4
    scratch_b = TH * W * 9 * Cin_p * 2 * 2 + TH * W * Cout_p * 4
    est = 2 * in_tile_b + 2 * out_tile_b + 2 * w_b + scratch_b
    vmem_limit = int(min(max(2 * est, 16 * 1024 * 1024), 48 * 1024 * 1024))

    out_nhwc = pl.pallas_call(
        conv_bn_leaky_kernel,
        out_shape=jax.ShapeDtypeStruct((N, H_pad, W, Cout_p), jnp.float32),
        grid_spec=pltpu.PrefetchScalarGridSpec(
            num_scalar_prefetch=0,
            grid=(N, HT),
            in_specs=[
                pl.BlockSpec((pl.Squeezed(), pl.Squeezed(), TH + 2, W + 2, Cin_p),
                             lambda n, h: (n, h, 0, 0, 0)),
                pl.BlockSpec((9 * Cin_p, Cout_p), lambda n, h: (0, 0)),   # grid-invariant
                pl.BlockSpec((1, Cout_p), lambda n, h: (0, 0)),           # grid-invariant
            ],
            out_specs=pl.BlockSpec((pl.Squeezed(), TH, W, Cout_p),
                                   lambda n, h: (n, h, 0, 0)),
        ),
        compiler_params=pltpu.CompilerParams(
            dimension_semantics=("parallel", "parallel"),
            vmem_limit_bytes=vmem_limit),
    )(x_tiles, w2, shift2)

    out_nhwc = out_nhwc[:, :H, :, :Cout]                 # drop H remainder + channel padding
    return jnp.transpose(out_nhwc, (0, 3, 1, 2))         # back to NCHW


def reference_forward(x_nchw, w_oihw, conv_bias, gamma, beta,
                      running_mean, running_var, eps=1e-4):
    """Pure-JAX f32 reference (lax conv) matching the PyTorch module semantics."""
    y = jax.lax.conv_general_dilated(
        x_nchw.astype(jnp.float32), w_oihw.astype(jnp.float32),
        window_strides=(1, 1), padding=((1, 1), (1, 1)),
        dimension_numbers=("NCHW", "OIHW", "NCHW"))
    y = y + conv_bias.reshape(1, -1, 1, 1)
    inv_std = 1.0 / jnp.sqrt(running_var + eps)
    y = (y - running_mean.reshape(1, -1, 1, 1)) * (gamma * inv_std).reshape(1, -1, 1, 1) \
        + beta.reshape(1, -1, 1, 1)
    return jnp.where(y > 0, y, 0.1 * y)


if __name__ == "__main__":
    key = jax.random.PRNGKey(0)
    k_x, k_w, k_b, k_g, k_beta, k_rm, k_rv = jax.random.split(key, 7)

    N, Cin, H, W = 2, 4, 16, 16
    Cout, K = 8, 3

    x = jax.random.normal(k_x, (N, Cin, H, W), dtype=jnp.float32)
    # Deterministic synthetic parameters (shapes from nn.Conv2d / nn.BatchNorm2d).
    w = jax.random.normal(k_w, (Cout, Cin, K, K), dtype=jnp.float32) * 0.1
    conv_bias = jax.random.normal(k_b, (Cout,), dtype=jnp.float32) * 0.05
    gamma = 1.0 + 0.1 * jax.random.normal(k_g, (Cout,), dtype=jnp.float32)
    beta = 0.1 * jax.random.normal(k_beta, (Cout,), dtype=jnp.float32)
    running_mean = 0.1 * jax.random.normal(k_rm, (Cout,), dtype=jnp.float32)
    running_var = jnp.abs(1.0 + 0.1 * jax.random.normal(k_rv, (Cout,), dtype=jnp.float32))

    # tile_h=8 -> grid=(2 batches, 2 H-tiles); M = TH*W = 128 rows per GEMM.
    out = conv_layer_forward(x, w, conv_bias, gamma, beta, running_mean, running_var,
                             tile_h=8)
    out = jax.block_until_ready(out)

    ref = reference_forward(x, w, conv_bias, gamma, beta, running_mean, running_var)
    assert out.shape == (N, Cout, H, W)
    # Tolerance reflects bf16 conv inputs/weights with f32 accumulation (vs. all-f32 reference).
    assert jnp.allclose(out, ref, atol=5e-2, rtol=5e-2), "mismatch vs reference"

    print("KERNEL_OK")
</pallas_src>

<mosaic_0001>
module attributes {stable_mosaic.version = 11 : i64} {
  func.func @conv_bn_leaky_kernel(%arg0: i32, %arg1: i32, %arg2: memref<1x1x10x18x128xbf16, #tpu.memory_space<vmem>>, %arg3: memref<1152x128xbf16, #tpu.memory_space<vmem>>, %arg4: memref<1x128xf32, #tpu.memory_space<vmem>>, %arg5: memref<1x8x16x128xf32, #tpu.memory_space<vmem>>) attributes {dimension_semantics = [#tpu.dimension_semantics<parallel>, #tpu.dimension_semantics<parallel>], iteration_bounds = array<i64: 2, 2>, scalar_prefetch = 0 : i64, scratch_operands = 0 : i64, tpu.core_type = #tpu.core_type<tc>, window_params = [{transform_indices = @transform_0, window_bounds = array<i64: 1, 1, 10, 18, 128>}, {pipeline_mode = #tpu.pipeline_mode<synchronous>, transform_indices = @transform_1, window_bounds = array<i64: 1152, 128>}, {pipeline_mode = #tpu.pipeline_mode<synchronous>, transform_indices = @transform_2, window_bounds = array<i64: 1, 128>}, {transform_indices = @transform_3, window_bounds = array<i64: 1, 8, 16, 128>}]} {
    %c0 = arith.constant 0 : index
    %c0_0 = arith.constant 0 : index
    %c0_1 = arith.constant 0 : index
    %c0_2 = arith.constant 0 : index
    %c0_3 = arith.constant 0 : index
    %0 = vector.load %arg2[%c0, %c0_0, %c0_1, %c0_2, %c0_3] : memref<1x1x10x18x128xbf16, #tpu.memory_space<vmem>>, vector<1x1x8x16x128xbf16>
    %1 = vector.shape_cast %0 : vector<1x1x8x16x128xbf16> to vector<8x16x128xbf16>
    %c0_4 = arith.constant 0 : index
    %c0_5 = arith.constant 0 : index
    %c0_6 = arith.constant 0 : index
    %c1 = arith.constant 1 : index
    %c0_7 = arith.constant 0 : index
    %2 = vector.load %arg2[%c0_4, %c0_5, %c0_6, %c1, %c0_7] : memref<1x1x10x18x128xbf16, #tpu.memory_space<vmem>>, vector<1x1x8x16x128xbf16>
    %3 = vector.shape_cast %2 : vector<1x1x8x16x128xbf16> to vector<8x16x128xbf16>
    %c0_8 = arith.constant 0 : index
    %c0_9 = arith.constant 0 : index
    %c0_10 = arith.constant 0 : index
    %c2 = arith.constant 2 : index
    %c0_11 = arith.constant 0 : index
    %4 = vector.load %arg2[%c0_8, %c0_9, %c0_10, %c2, %c0_11] : memref<1x1x10x18x128xbf16, #tpu.memory_space<vmem>>, vector<1x1x8x16x128xbf16>
    %5 = vector.shape_cast %4 : vector<1x1x8x16x128xbf16> to vector<8x16x128xbf16>
    %c0_12 = arith.constant 0 : index
    %c0_13 = arith.constant 0 : index
    %c1_14 = arith.constant 1 : index
    %c0_15 = arith.constant 0 : index
    %c0_16 = arith.constant 0 : index
    %6 = vector.load %arg2[%c0_12, %c0_13, %c1_14, %c0_15, %c0_16] : memref<1x1x10x18x128xbf16, #tpu.memory_space<vmem>>, vector<1x1x8x16x128xbf16>
    %7 = vector.shape_cast %6 : vector<1x1x8x16x128xbf16> to vector<8x16x128xbf16>
    %c0_17 = arith.constant 0 : index
    %c0_18 = arith.constant 0 : index
    %c1_19 = arith.constant 1 : index
    %c1_20 = arith.constant 1 : index
    %c0_21 = arith.constant 0 : index
    %8 = vector.load %arg2[%c0_17, %c0_18, %c1_19, %c1_20, %c0_21] : memref<1x1x10x18x128xbf16, #tpu.memory_space<vmem>>, vector<1x1x8x16x128xbf16>
    %9 = vector.shape_cast %8 : vector<1x1x8x16x128xbf16> to vector<8x16x128xbf16>
    %c0_22 = arith.constant 0 : index
    %c0_23 = arith.constant 0 : index
    %c1_24 = arith.constant 1 : index
    %c2_25 = arith.constant 2 : index
    %c0_26 = arith.constant 0 : index
    %10 = vector.load %arg2[%c0_22, %c0_23, %c1_24, %c2_25, %c0_26] : memref<1x1x10x18x128xbf16, #tpu.memory_space<vmem>>, vector<1x1x8x16x128xbf16>
    %11 = vector.shape_cast %10 : vector<1x1x8x16x128xbf16> to vector<8x16x128xbf16>
    %c0_27 = arith.constant 0 : index
    %c0_28 = arith.constant 0 : index
    %c2_29 = arith.constant 2 : index
    %c0_30 = arith.constant 0 : index
    %c0_31 = arith.constant 0 : index
    %12 = vector.load %arg2[%c0_27, %c0_28, %c2_29, %c0_30, %c0_31] : memref<1x1x10x18x128xbf16, #tpu.memory_space<vmem>>, vector<1x1x8x16x128xbf16>
    %13 = vector.shape_cast %12 : vector<1x1x8x16x128xbf16> to vector<8x16x128xbf16>
    %c0_32 = arith.constant 0 : index
    %c0_33 = arith.constant 0 : index
    %c2_34 = arith.constant 2 : index
    %c1_35 = arith.constant 1 : index
    %c0_36 = arith.constant 0 : index
    %14 = vector.load %arg2[%c0_32, %c0_33, %c2_34, %c1_35, %c0_36] : memref<1x1x10x18x128xbf16, #tpu.memory_space<vmem>>, vector<1x1x8x16x128xbf16>
    %15 = vector.shape_cast %14 : vector<1x1x8x16x128xbf16> to vector<8x16x128xbf16>
    %c0_37 = arith.constant 0 : index
    %c0_38 = arith.constant 0 : index
    %c2_39 = arith.constant 2 : index
    %c2_40 = arith.constant 2 : index
    %c0_41 = arith.constant 0 : index
    %16 = vector.load %arg2[%c0_37, %c0_38, %c2_39, %c2_40, %c0_41] : memref<1x1x10x18x128xbf16, #tpu.memory_space<vmem>>, vector<1x1x8x16x128xbf16>
    %17 = vector.shape_cast %16 : vector<1x1x8x16x128xbf16> to vector<8x16x128xbf16>
    %18 = tpu.concatenate %1, %3, %5, %7, %9, %11, %13, %15, %17 in 2 : vector<8x16x128xbf16>, vector<8x16x128xbf16>, vector<8x16x128xbf16>, vector<8x16x128xbf16>, vector<8x16x128xbf16>, vector<8x16x128xbf16>, vector<8x16x128xbf16>, vector<8x16x128xbf16>, vector<8x16x128xbf16> -> vector<8x16x1152xbf16>
    %19 = vector.shape_cast %18 : vector<8x16x1152xbf16> to vector<128x1152xbf16>
    %c0_42 = arith.constant 0 : index
    %c0_43 = arith.constant 0 : index
    %20 = vector.load %arg3[%c0_42, %c0_43] : memref<1152x128xbf16, #tpu.memory_space<vmem>>, vector<1152x128xbf16>
    %cst = arith.constant dense<0.000000e+00> : vector<128x128xf32>
    %21 = tpu.matmul %19, %20, %cst {dimension_numbers = #tpu.dot_dimension_numbers<[1], [0], [0], [1], [0, 0, 1, 1], [], []>} : vector<128x1152xbf16>, vector<1152x128xbf16>, vector<128x128xf32> -> vector<128x128xf32>
    %c0_44 = arith.constant 0 : index
    %c0_45 = arith.constant 0 : index
    %22 = vector.load %arg4[%c0_44, %c0_45] : memref<1x128xf32, #tpu.memory_space<vmem>>, vector<1x128xf32>
    %23 = vector.broadcast %22 : vector<1x128xf32> to vector<128x128xf32>
    %24 = arith.addf %21, %23 : vector<128x128xf32>
    %cst_46 = arith.constant 0.000000e+00 : f32
    %25 = vector.broadcast %cst_46 : f32 to vector<128x128xf32>
    %26 = arith.cmpf ogt, %24, %25 : vector<128x128xf32>
    %cst_47 = arith.constant 1.000000e-01 : f32
    %27 = vector.broadcast %cst_47 : f32 to vector<128x128xf32>
    %28 = arith.mulf %27, %24 : vector<128x128xf32>
    %29 = arith.select %26, %24, %28 : vector<128x128xi1>, vector<128x128xf32>
    %30 = vector.shape_cast %29 : vector<128x128xf32> to vector<8x16x128xf32>
    %c0_48 = arith.constant 0 : index
    %c0_49 = arith.constant 0 : index
    %c0_50 = arith.constant 0 : index
    %c0_51 = arith.constant 0 : index
    %31 = vector.load %arg5[%c0_48, %c0_49, %c0_50, %c0_51] : memref<1x8x16x128xf32, #tpu.memory_space<vmem>>, vector<1x8x16x128xf32>
    %32 = vector.shape_cast %31 : vector<1x8x16x128xf32> to vector<8x16x128xf32>
    %33 = vector.shape_cast %30 : vector<8x16x128xf32> to vector<1x8x16x128xf32>
    tpu.vector_store %arg5[%c0_48, %c0_49, %c0_50, %c0_51], %33 {strides = array<i32>} : memref<1x8x16x128xf32, #tpu.memory_space<vmem>>, vector<1x8x16x128xf32>,
    return
  }
  func.func @transform_0(%arg0: i32, %arg1: i32) -> (i32, i32, i32, i32, i32) {
    %c0_i32 = arith.constant 0 : i32
    %c0_i32_0 = arith.constant 0 : i32
    %c0_i32_1 = arith.constant 0 : i32
    %c0_i32_2 = arith.constant 0 : i32
    return %arg0, %arg1, %c0_i32, %c0_i32_0, %c0_i32_1 : i32, i32, i32, i32, i32
  }
  func.func @transform_1(%arg0: i32, %arg1: i32) -> (i32, i32) {
    %c0_i32 = arith.constant 0 : i32
    %c0_i32_0 = arith.constant 0 : i32
    %c0_i32_1 = arith.constant 0 : i32
    return %c0_i32, %c0_i32_0 : i32, i32
  }
  func.func @transform_2(%arg0: i32, %arg1: i32) -> (i32, i32) {
    %c0_i32 = arith.constant 0 : i32
    %c0_i32_0 = arith.constant 0 : i32
    %c0_i32_1 = arith.constant 0 : i32
    return %c0_i32, %c0_i32_0 : i32, i32
  }
  func.func @transform_3(%arg0: i32, %arg1: i32) -> (i32, i32, i32, i32) {
    %c0_i32 = arith.constant 0 : i32
    %c0_i32_0 = arith.constant 0 : i32
    %c0_i32_1 = arith.constant 0 : i32
    return %arg0, %arg1, %c0_i32, %c0_i32_0 : i32, i32, i32, i32
  }
}

</mosaic_0001>

<bundles_post_ra>
// kernel: tpu_custom_call.1
= control target key start
LH: loop header
LB: loop body
LE: loop exit
PB: predicated region body
PF: predicated region fallthrough
CT: control target
= control target key end

     0   :  { %8 = vsyncpa [#allocation3], 0  ;;  %s3720_s0 = inlined_call_operand.vmem [shape: bf16[2,2,10,18,128], index: 0, kind: input, shape index: {}]   ;;  %s3721_s1 = inlined_call_operand.vmem [shape: bf16[1152,128], index: 1, kind: input, shape index: {}]   ;;  %s3722_s2 = inlined_call_operand.vmem [shape: f32[1,128], index: 2, kind: input, shape index: {}]   ;;  %s3723_s3 = inlined_call_operand.hbm [shape: f32[2,16,16,128], index: 3, kind: output, shape index: {}]  }
   0x1   :  { %10 = vsyncpa [#allocation3 + $0x1], 0  ;;  %s2971_s12 = smov 0   ;;  %s2973_s13 = smov 0  }
   0x2   :  { %s2975_s14 = smov 0   ;;  %s2977_s15 = smov 0  }
   0x3   :  { %s2979_s16 = smov 0   ;;  %s2981_s17 = smov 0  }
   0x4   :  { %s2983_s18 = smov 0   ;;  %s2985_s19 = smov 0  }
   0x5 LB: > { %s2183_s20 = sadd.s32 4294967295, %s2947_s19   ;;  %s2184_s21 = sadd.s32 4294967294, %s2947_s19   ;;  %s2947_s19 = sphi %s2985_s19, %s16_s19   ;;  %s2943_s18 = sphi %s2983_s18, %s3732_s18   ;;  %s2939_s17 = sphi %s2981_s17, %s3731_s17   ;;  %s2935_s16 = sphi %s2979_s16, %s3730_s16   ;;  %s2931_s15 = sphi %s2977_s15, %s3729_s15   ;;  %s2927_s14 = sphi %s2975_s14, %s3728_s14   ;;  %s2923_s13 = sphi %s2973_s13, %s3727_s13   ;;  %s2919_s12 = sphi %s2971_s12, %s3726_s12  }
   0x6   : > { %s25_s22 = sadd.s32 1, %s2939_s17  ;;  %s28_s23 = sadd.s32 1, %s2943_s18 }
   0x7   : > { %p26_p0 = scmp.ge.s32.totalorder %s25_s22, 2  ;;  %p117_p1 = scmp.ne.s32.totalorder %s2927_s14, %s2923_s13 }
   0x8   : > { %p118_p2 = scmp.eq.s32.totalorder %s2183_s20, 3  ;;  %p123_p5 = scmp.ne.s32.totalorder %s2923_s13, %s2919_s12 }
   0x9   : > { %s3734_s22 = smov (%p26_p0, %s25_s22), 0  ;;  %s3736_s23 = smov (!%p26_p0, %s28_s23), %s2943_s18 }
   0xa   : > { %s103_s24 = ssub.s32 %s2939_s17, %s3734_s22  ;;  %p3022_p3 = por %p118_p2, %p117_p1 }
   0xb   : > { %p30_p4 = scmp.ge.s32.totalorder %s3736_s23, 2  ;;  %p124_p6 = scmp.eq.s32.totalorder %s2184_s21, 3 }
   0xc   : > { %p2187_p7 = scmp.ge.s32.totalorder %s2947_s19, 1  ;;  %p160_p9 = scmp.lt.s32.totalorder %s2947_s19, 5 }
   0xd   : > { %s3738_s23 = smov (%p30_p4, %s3736_s23), 0  ;;  %p3031_p8 = por %p124_p6, %p123_p5 }
   0xe   : > { %s102_s27 = ssub.s32 %s2943_s18, %s3738_s23  ;;  %s107_s28 = sadd.s32 1, %s2927_s14 }
   0xf   : > { %s104_s29 = sor.u32 %s103_s24, %s102_s27  ;;  %p161_p10 = pnand %p2187_p7, %p160_p9 }
  0x10   : > { %p105_p11 = scmp.eq.s32.totalorder %s104_s29, 0  ;;  %p188_p12 = scmp.lt.s32.totalorder (!%p161_p10), %s2935_s16, 1 }
  0x11   : > { %164 = sbr.rel (%p161_p10) target bundleno = 479 (0x1df), region = 32  ;;  %p190_p13 = scmp.lt.s32.totalorder (!%p161_p10), %s2931_s15, 1 }
  0x12   : > { %s3040_s30 = scalar_select %p105_p11, %s2927_s14, %s107_s28  }
  0x13   : > { %s2545_s4 = sshll.u32 (!%p161_p10), %s2935_s16, 5 }
  0x16   : > { %v2556_v0 = vld [vmem:[%s3721_s1 + $0x38] sm:$0xff]  ;;  %v2555_v1 = vld [vmem:[%s3721_s1 + $0x30] sm:$0xff]  ;;  %v2554_v2 = vld [vmem:[%s3721_s1 + $0x28] sm:$0xff]  ;;  %s189_s20 = scalar_select %p188_p12, %s2935_s16, 1  ;;  %vm368_vm0 = vsmask.f32 7424 }
  0x17   : > { %2717 = vmatpush.bf16.msra.mxu1 %v2556_v0  ;;  %2718 = vmatpush.bf16.msra.mxu2 %v2556_v0  ;;  %v2553_v3 = vld [vmem:[%s3721_s1 + $0x20] sm:$0xff]  ;;  %s191_s21 = scalar_select %p190_p13, %s2931_s15, 1  ;;  %v2552_v4 = vld [vmem:[%s3721_s1 + $0x18] sm:$0xff]  ;;  %v2551_v5 = vld [vmem:[%s3721_s1 + $0x10] sm:$0xff]  ;;  %vm497_vm1 = vcmask 1046528  }
  0x18   : > { %2719 = vmatpush.bf16.msra.mxu3 %v2556_v0  ;;  %1574 = vmatpush.bf16.msra.mxu0 %v2556_v0  ;;  %s2742_s28 = smul.u32 60, %s189_s20  ;;  %v2550_v6 = vld [vmem:[%s3721_s1 + $0x8] sm:$0xff]  ;;  %v2549_v7 = vld [vmem:[%s3721_s1] sm:$0xff]  ;;  %v2572_v8 = vld [vmem:[%s3721_s1 + $0xb8] sm:$0xff] }
  0x19   : > { %s2741_s29 = smul.u32 30, %s191_s21  ;;  %v2564_v9 = vld [vmem:[%s3721_s1 + $0x78] sm:$0xff]  ;;  %v2571_v16 = vld [vmem:[%s3721_s1 + $0xb0] sm:$0xff]  ;;  %v2570_v20 = vld [vmem:[%s3721_s1 + $0xa8] sm:$0xff] }
  0x1a   : > { %v2580_v12 = vld [vmem:[%s3721_s1 + $0xf8] sm:$0xff]  ;;  %v2563_v17 = vld [vmem:[%s3721_s1 + $0x70] sm:$0xff]  ;;  %v2562_v21 = vld [vmem:[%s3721_s1 + $0x68] sm:$0xff] }
  0x1b   : > { %2720 = vmatpush.bf16.msra.mxu1 %v2555_v1  ;;  %2721 = vmatpush.bf16.msra.mxu2 %v2555_v1  ;;  %s194_s6 = sadd.s32 %s2742_s28, %s2741_s29  ;;  %v2588_v15 = vld [vmem:[%s3721_s1 + $0x138] sm:$0xff]  ;;  %v2579_v18 = vld [vmem:[%s3721_s1 + $0xf0] sm:$0xff]  ;;  %v2578_v22 = vld [vmem:[%s3721_s1 + $0xe8] sm:$0xff]  ;;  %s2621_s29 = sshll.u32 %s2931_s15, 4 }
  0x1c   : > { %2722 = vmatpush.bf16.msra.mxu3 %v2555_v1  ;;  %1575 = vmatpush.bf16.msra.mxu0 %v2555_v1  ;;  %s2189_s9 = sshll.u32 %s194_s6, 2  ;;  %v2587_v19 = vld [vmem:[%s3721_s1 + $0x130] sm:$0xff]  ;;  %v2586_v27 = vld [vmem:[%s3721_s1 + $0x128] sm:$0xff]  ;;  %v2569_v32 = vld [vmem:[%s3721_s1 + $0xa0] sm:$0xff]  ;;  %s2092_s5 = sadd.s32 %s2621_s29, %s2545_s4 }
  0x1d   : > { %s3073_s24 = scalar_lea.vmem %s3720_s0, %s2189_s9  ;;  %v2561_v33 = vld [vmem:[%s3721_s1 + $0x60] sm:$0xff]  ;;  %v2568_v39 = vld [vmem:[%s3721_s1 + $0x98] sm:$0xff]  ;;  %v2567_v46 = vld [vmem:[%s3721_s1 + $0x90] sm:$0xff]  ;;  %s2546_s6 = sshll.u32 %s2092_s5, 3 }
  0x1e   : > { %v3082_v10 = vld [vmem:[%s3073_s24 + $0x18] sm:$0xff]   ;;  %v3085_v11 = vld [vmem:[%s3073_s24 + $0x30] sm:$0xff]   ;;  %v3091_v13 = vld [vmem:[%s3073_s24 + $0x48] sm:$0xff]   ;;  %s2094_s7 = scalar_lea.hbm %s3723_s3, %s2546_s6  ;;  %s2873_s29 = scalar_lea.hbm %s3723_s3, 512 }
  0x1f   : > { %2723 = vmatpush.bf16.msra.mxu1 %v2554_v2  ;;  %2724 = vmatpush.bf16.msra.mxu2 %v2554_v2  ;;  %v3094_v14 = vld [vmem:[%s3073_s24] sm:$0xff]   ;;  %v3128_v24 = vld [vmem:[%s3073_s24 + $0x24] sm:$0xf0]  ;;  %v3140_v28 = vld [vmem:[%s3073_s24 + $0x54] sm:$0xff]   ;;  %s2097_s9 = sshll.u32 %s2094_s7, 4  ;;  %s2098_s9 = int_to_ptr.hbm [resolvable:$true] %s2097_s9 }
  0x20   : > { %2725 = vmatpush.bf16.msra.mxu3 %v2554_v2  ;;  %1576 = vmatpush.bf16.msra.mxu0 %v2554_v2  ;;  %v3125_v23 = vld [vmem:[%s3073_s24 + $0x24] sm:$0xff]   ;;  %v3131_v25 = vld [vmem:[%s3073_s24 + $0x3c] sm:$0xff]   ;;  %v3143_v29 = vld [vmem:[%s3073_s24 + $0x54] sm:$0xf0]  ;;  %v372_v48 = vshll.u32 %v3094_v14, 16  ;;  %v370_v58 = vshrl.u32 %v3094_v14, 16 }
  0x21   : > { %v3134_v26 = vld [vmem:[%s3073_s24 + $0x3c] sm:$0xf0]  ;;  %v3146_v30 = vld [vmem:[%s3073_s24 + $0xc] sm:$0xff]   ;;  %v214_v38 = vld [vmem:[%s3073_s24 + $0x8] sm:$0x1]  ;;  %s2867_s11 = sshra.s32 %s2098_s9, 4  ;;  %s2868_s11 = int_to_ptr.hbm [resolvable:$true] %s2867_s11 }
  0x22   : > { %v3149_v31 = vld [vmem:[%s3073_s24 + $0xc] sm:$0xf0]  ;;  %v2577_v36 = vld [vmem:[%s3721_s1 + $0xe0] sm:$0xff]  ;;  %v2560_v40 = vld [vmem:[%s3721_s1 + $0x58] sm:$0xff]  ;;  %v352_v42 = vunpack.c.l.b16 %v214_v38  ;;  %v374_v59 = vrot.slane %v372_v48, 1  ;;  %s2869_s20 = scalar_lea.hbm %s2868_s11, 128  ;;  %p2874_p4 = scmp.lt.s32.totalorder %s2868_s11, %s3723_s3 }
  0x23   : > { %2726 = vmatpush.bf16.msra.mxu1 %v2553_v3  ;;  %2727 = vmatpush.bf16.msra.mxu2 %v2553_v3  ;;  %v3158_v34 = vld [vmem:[%s3073_s24 + $0xc] sm:$0xff]   ;;  %v2585_v37 = vld [vmem:[%s3721_s1 + $0x120] sm:$0xff]  ;;  %v2206_v41 = vld [vmem:[%s3073_s24 + $0x14] sm:$0x1]  ;;  %p2870_p0 = scmp.ne.s32.totalorder %s2868_s11, %s2869_s20  ;;  %p2875_p5 = scmp.lt.s32.totalorder %s2873_s29, %s2869_s20 }
  0x24   : > { %2728 = vmatpush.bf16.msra.mxu3 %v2553_v3  ;;  %1577 = vmatpush.bf16.msra.mxu0 %v2553_v3  ;;  %v3161_v35 = vld [vmem:[%s3073_s24 + $0xc] sm:$0xf0]  ;;  %v2576_v43 = vld [vmem:[%s3721_s1 + $0xd8] sm:$0xff]  ;;  %v586_v45 = vunpack.c.l.b16 %v2206_v41  ;;  %v360_v50 = vpack.c.b16 %v352_v42, %v352_v42  ;;  %v2681_v52 = vld [vmem:[%s3073_s24] sm:$0xf0]  ;;  %v605_v54 = vshll.u32 %v3158_v34, 16 }
  0x25   : > { %v2584_v44 = vld [vmem:[%s3721_s1 + $0x118] sm:$0xff]  ;;  %v2559_v47 = vld [vmem:[%s3721_s1 + $0x50] sm:$0xff]  ;;  %v2682_v53 = vld [vmem:[%s3073_s24] sm:$0xe]  ;;  %v603_v0 = vshrl.u32 %v3158_v34, 16  ;;  %p2871_p1 = pnand %p2870_p0, %p3022_p3  ;;  %p2876_p6 = por %p2875_p5, %p2874_p4 }
  0x26   : > { %v2575_v49 = vld [vmem:[%s3721_s1 + $0xd0] sm:$0xff]  ;;  %v3203_v55 = vpack.c.b16 %v586_v45, %v586_v45  ;;  %v2566_v56 = vld [vmem:[%s3721_s1 + $0x88] sm:$0xff]  ;;  %v377_v60 = vshll.u32 %v360_v50, 16  ;;  %v2683_v61 = vor.u32 %v2682_v53, %v2681_v52  ;;  %v607_v1 = vrot.slane %v605_v54, 1  ;;  %v2565_v3 = vld [vmem:[%s3721_s1 + $0x80] sm:$0xff] }
  0x27   : > { %2729 = vmatpush.bf16.msra.mxu1 %v2552_v4  ;;  %2730 = vmatpush.bf16.msra.mxu2 %v2552_v4  ;;  %v2583_v51 = vld [vmem:[%s3721_s1 + $0x110] sm:$0xff]  ;;  %v2558_v57 = vld [vmem:[%s3721_s1 + $0x48] sm:$0xff]  ;;  %v394_v53 = vshrl.u32 %v3082_v10, 16  ;;  %p2872_p2 = pneg %p2871_p1 }
  0x28   : > { %2731 = vmatpush.bf16.msra.mxu3 %v2552_v4  ;;  %1578 = vmatpush.bf16.msra.mxu0 %v2552_v4  ;;  %v2574_v62 = vld [vmem:[%s3721_s1 + $0xc8] sm:$0xff]  ;;  %v610_v2 = vshll.u32 %v3203_v55, 16  ;;  %v2557_v4 = vld [vmem:[%s3721_s1 + $0x40] sm:$0xff]  ;;  %v2619_v41 = vld [vmem:[%s3721_s1 + $0x230] sm:$0xff] }
  0x29   : > { %v2582_v63 = vld [vmem:[%s3721_s1 + $0x108] sm:$0xff]  ;;  %p2877_p7 = pnand %p2876_p6, %p2872_p2 }
  0x2a   : > { %v2618_v48 = vld [vmem:[%s3721_s1 + $0x228] sm:$0xff] }
  0x2b   : > { %2732 = vmatpush.bf16.msra.mxu1 %v2551_v5  ;;  %2733 = vmatpush.bf16.msra.mxu2 %v2551_v5 }
  0x2c   : > { %2734 = vmatpush.bf16.msra.mxu3 %v2551_v5  ;;  %1579 = vmatpush.bf16.msra.mxu0 %v2551_v5  ;;  %v2604_v5 = vld [vmem:[%s3721_s1 + $0x1b8] sm:$0xff] }
  0x2f   : > { %2735 = vmatpush.bf16.msra.mxu1 %v2550_v6  ;;  %2736 = vmatpush.bf16.msra.mxu2 %v2550_v6 }
  0x30   : > { %2737 = vmatpush.bf16.msra.mxu3 %v2550_v6  ;;  %1580 = vmatpush.bf16.msra.mxu0 %v2550_v6  ;;  %v2596_v6 = vld [vmem:[%s3721_s1 + $0x178] sm:$0xff] }
  0x33   : > { %2738 = vmatpush.bf16.msra.mxu1 %v2549_v7  ;;  %2739 = vmatpush.bf16.msra.mxu2 %v2549_v7 }
  0x34   : > { %2740 = vmatpush.bf16.msra.mxu3 %v2549_v7  ;;  %1581 = vmatpush.bf16.msra.mxu0 %v2549_v7  ;;  %v375_v7 = vor.u32 %v374_v59, %v370_v58  ;;  %v3285_v58 = vld [vmem:[%s3073_s24 + $0x24] sm:$0xf0] }
  0x36   : > { %1592 = vmatmul.bf16.vlgmr.msra.gmra.mxu1 %v3082_v10  ;;  %1602 = vmatmul.bf16.vlgmr.msra.gmra.mxu2 %v3085_v11 }
  0x37   : > { %1672 = vmatpush.bf16.msrb.mxu2 %v2572_v8  ;;  %1623 = vmatpush.bf16.msrb.mxu1 %v2564_v9  ;;  %v2573_v8 = vld [vmem:[%s3721_s1 + $0xc0] sm:$0xff] }
  0x38   : > { %1612 = vmatmul.bf16.vlgmr.msra.gmra.mxu3 %v3091_v13  ;;  %1582 = vmatmul.bf16.vlgmr.msra.gmra.mxu0 %v3094_v14  ;;  %v2581_v9 = vld [vmem:[%s3721_s1 + $0x100] sm:$0xff]  ;;  %v498_v14 = vrot.slane %v2683_v61, 1 }
  0x39   : > { %1721 = vmatpush.bf16.msrb.mxu3 %v2580_v12  ;;  %1770 = vmatpush.bf16.msrb.mxu0 %v2588_v15  ;;  %v379_v12 = vrot.slane %v377_v60, 1  ;;  %v499_v15 = vrot.slane %v360_v50, 1 }
  0x3b   : > { %1673 = vmatpush.bf16.msrb.mxu2 %v2571_v16  ;;  %1624 = vmatpush.bf16.msrb.mxu1 %v2563_v17  ;;  %v608_v16 = vor.u32 %v607_v1, %v603_v0  ;;  %v612_v17 = vrot.slane %v610_v2, 1  ;;  %v2208_v0 = vld [vmem:[%s3073_s24 + $0x2c] sm:$0x1] }
  0x3d   : > { %1722 = vmatpush.bf16.msrb.mxu3 %v2579_v18  ;;  %1771 = vmatpush.bf16.msrb.mxu0 %v2587_v19  ;;  %v215_v18 = vld [vmem:[%s3073_s24 + $0x14] sm:$0x1]  ;;  %v2612_v19 = vld [vmem:[%s3721_s1 + $0x1f8] sm:$0xff] }
  0x3f   : > { %1674 = vmatpush.bf16.msrb.mxu2 %v2570_v20  ;;  %1625 = vmatpush.bf16.msrb.mxu1 %v2562_v21  ;;  %v2620_v20 = vld [vmem:[%s3721_s1 + $0x238] sm:$0xff]  ;;  %v2207_v21 = vld [vmem:[%s3073_s24 + $0x20] sm:$0x1] }
  0x40   : > { %v587_v38 = vunpack.c.l.b16 %v2207_v21 }
  0x41   : > { %1723 = vmatpush.bf16.msrb.mxu3 %v2578_v22  ;;  %1772 = vmatpush.bf16.msrb.mxu0 %v2586_v27  ;;  %v380_v22 = vsel %vm368_vm0, %v375_v7, %v379_v12  ;;  %v500_v27 = vsel %vm497_vm1, %v498_v14, %v499_v15  ;;  %v2601_v7 = vld [vmem:[%s3721_s1 + $0x1a0] sm:$0xff]  ;;  %v2684_v12 = vld [vmem:[%s3073_s24 + $0x18] sm:$0xf0]  ;;  %v2685_v14 = vld [vmem:[%s3073_s24 + $0x18] sm:$0xe] }
  0x42   : > { %v3265_v45 = vpack.c.b16 %v587_v38, %v587_v38  ;;  %v2209_v38 = vld [vmem:[%s3073_s24 + $0x38] sm:$0x1] }
  0x43   : > { %1675 = vmatpush.bf16.msrb.mxu2 %v2569_v32  ;;  %1626 = vmatpush.bf16.msrb.mxu1 %v2561_v33  ;;  %v353_v32 = vunpack.c.l.b16 %v215_v18  ;;  %v613_v33 = vsel %vm368_vm0, %v608_v16, %v612_v17  ;;  %v2686_v18 = vor.u32 %v2685_v14, %v2684_v12  ;;  %v2599_v12 = vld [vmem:[%s3721_s1 + $0x190] sm:$0xff] }
  0x44   : > { %v2607_v14 = vld [vmem:[%s3721_s1 + $0x1d0] sm:$0xff] }
  0x45   : > { %1724 = vmatpush.bf16.msrb.mxu3 %v2577_v36  ;;  %1773 = vmatpush.bf16.msrb.mxu0 %v2585_v37  ;;  %v2818_v36 = vld [vmem:[%s3073_s24 + $0xc] sm:$0xe]  ;;  %v2603_v37 = vld [vmem:[%s3721_s1 + $0x1b0] sm:$0xff]  ;;  %v361_v42 = vpack.c.b16 %v353_v32, %v353_v32 }
  0x46   : > { %1597 = vmatmul.bf16.gmra.mxu1 %v3125_v23  ;;  %1607 = vmatmul.bf16.gmra.mxu2 %v3131_v25  ;;  %v2819_v52 = vor.u32 %v2818_v36, %v3149_v31 }
  0x47   : > { %1676 = vmatpush.bf16.msrb.mxu2 %v2568_v39  ;;  %1627 = vmatpush.bf16.msrb.mxu1 %v2560_v40  ;;  %v2595_v39 = vld [vmem:[%s3721_s1 + $0x170] sm:$0xff]  ;;  %v502_v61 = vrot.slane %v361_v42, 1 }
  0x48   : > { %1617 = vmatmul.bf16.gmra.mxu3 %v3140_v28  ;;  %1587 = vmatmul.bf16.gmra.mxu0 %v3146_v30  ;;  %v2611_v40 = vld [vmem:[%s3721_s1 + $0x1f0] sm:$0xff]  ;;  %v501_v60 = vrot.slane %v2819_v52, 1  ;;  %v2616_v52 = vld [vmem:[%s3721_s1 + $0x218] sm:$0xff] }
  0x49   : > { %1725 = vmatpush.bf16.msrb.mxu3 %v2576_v43  ;;  %1774 = vmatpush.bf16.msrb.mxu0 %v2584_v44  ;;  %v384_v43 = vshll.u32 %v3146_v30, 16  ;;  %v396_v44 = vshll.u32 %v3082_v10, 16 }
  0x4a   : > { %v503_v2 = vsel %vm497_vm1, %v501_v60, %v502_v61  ;;  %v2198_v61 = vld [vmem:[%s3073_s24 + $0x3c] sm:$0xff]  }
  0x4b   : > { %1677 = vmatpush.bf16.msrb.mxu2 %v2567_v46  ;;  %1628 = vmatpush.bf16.msrb.mxu1 %v2559_v47  ;;  %v2602_v46 = vld [vmem:[%s3721_s1 + $0x1a8] sm:$0xff]  ;;  %v386_v50 = vrot.slane %v384_v43, 1  ;;  %v398_v54 = vrot.slane %v396_v44, 1  ;;  %v2821_v43 = vld [vmem:[%s3073_s24 + $0x24] sm:$0xe]  ;;  %v589_v44 = vunpack.c.l.b16 %v2209_v38 }
  0x4c   : > { %v2610_v47 = vld [vmem:[%s3721_s1 + $0x1e8] sm:$0xff] }
  0x4d   : > { %1726 = vmatpush.bf16.msrb.mxu3 %v2575_v49  ;;  %1775 = vmatpush.bf16.msrb.mxu0 %v2583_v51  ;;  %v382_v49 = vshrl.u32 %v3146_v30, 16  ;;  %v389_v51 = vshll.u32 %v361_v42, 16 }
  0x4f   : > { %1678 = vmatpush.bf16.msrb.mxu2 %v2566_v56  ;;  %1629 = vmatpush.bf16.msrb.mxu1 %v2558_v57  ;;  %v622_v56 = vshll.u32 %v3265_v45, 16  ;;  %v2194_v57 = vld [vmem:[%s3073_s24 + $0x24] sm:$0xff]   ;;  %v387_v59 = vor.u32 %v386_v50, %v382_v49  ;;  %v391_v30 = vrot.slane %v389_v51, 1  ;;  %v2592_v49 = vld [vmem:[%s3721_s1 + $0x158] sm:$0xff]  ;;  %v420_v50 = vshll.u32 %v3085_v11, 16 }
  0x50   : > { %v629_v16 = vshll.u32 %v2194_v57, 16  ;;  %v3327_v51 = vpack.c.b16 %v589_v44, %v589_v44 }
  0x51   : > { %1727 = vmatpush.bf16.msrb.mxu3 %v2574_v62  ;;  %1776 = vmatpush.bf16.msrb.mxu0 %v2582_v63  ;;  %v620_v62 = vor.u32 %v398_v54, %v394_v53  ;;  %v624_v31 = vrot.slane %v622_v56, 1  ;;  %v216_v63 = vld [vmem:[%s3073_s24 + $0x20] sm:$0x1]  ;;  %v392_v1 = vsel %vm368_vm0, %v387_v59, %v391_v30  ;;  %v406_v53 = vshrl.u32 %v3125_v23, 16 }
  0x52   : > { %v418_v59 = vshrl.u32 %v3085_v11, 16  ;;  %v422_v30 = vrot.slane %v420_v50, 1  ;;  %v646_v60 = vshll.u32 %v3327_v51, 16  ;;  %v2598_v50 = vld [vmem:[%s3721_s1 + $0x188] sm:$0xff] }
  0x53   : > { %1679 = vmatpush.bf16.msrb.mxu2 %v2565_v3  ;;  %1630 = vmatpush.bf16.msrb.mxu1 %v2557_v4  ;;  %v354_v3 = vunpack.c.l.b16 %v216_v63  ;;  %v625_v4 = vsel %vm368_vm0, %v620_v62, %v624_v31 }
  0x55   : > { %1728 = vmatpush.bf16.msrb.mxu3 %v2573_v8  ;;  %1777 = vmatpush.bf16.msrb.mxu0 %v2581_v9  ;;  %v2609_v8 = vld [vmem:[%s3721_s1 + $0x1e0] sm:$0xff] }
  0x56   : > { %1631 = vmatmul.bf16.vlgmr.msrb.gmra.mxu1 %v380_v22  ;;  %1680 = vmatmul.bf16.vlgmr.msrb.gmra.mxu2 %v500_v27  ;;  %v2593_v9 = vld [vmem:[%s3721_s1 + $0x160] sm:$0xff]  ;;  %v504_v27 = vrot.slane %v2686_v18, 1 }
  0x57   : > { %1868 = vmatpush.bf16.msra.mxu2 %v2604_v5  ;;  %1819 = vmatpush.bf16.msra.mxu1 %v2596_v6  ;;  %v588_v5 = vunpack.c.l.b16 %v2208_v0  ;;  %v362_v6 = vpack.c.b16 %v354_v3, %v354_v3  ;;  %v648_v3 = vrot.slane %v646_v60, 1  ;;  %v2590_v60 = vld [vmem:[%s3721_s1 + $0x148] sm:$0xff] }
  0x58   : > { %1729 = vmatmul.bf16.vlgmr.msrb.gmra.mxu3 %v3158_v34  ;;  %1778 = vmatmul.bf16.vlgmr.msrb.gmra.mxu0 %v613_v33  ;;  %v2594_v34 = vld [vmem:[%s3721_s1 + $0x168] sm:$0xff] }
  0x59   : > { %1917 = vmatpush.bf16.msra.mxu3 %v2612_v19  ;;  %1966 = vmatpush.bf16.msra.mxu0 %v2620_v20  ;;  %v3304_v15 = vpack.c.b16 %v588_v5, %v588_v5  ;;  %v401_v17 = vshll.u32 %v362_v6, 16  ;;  %v627_v19 = vshrl.u32 %v2194_v57, 16  ;;  %v631_v20 = vrot.slane %v629_v16, 1  ;;  %v2591_v16 = vld [vmem:[%s3721_s1 + $0x150] sm:$0xff] }
  0x5a   : > { %v505_v32 = vrot.slane %v362_v6, 1 }
  0x5b   : > { %1869 = vmatpush.bf16.msra.mxu2 %v2603_v37  ;;  %1820 = vmatpush.bf16.msra.mxu1 %v2595_v39  ;;  %v634_v21 = vshll.u32 %v3304_v15, 16  ;;  %v403_v22 = vrot.slane %v401_v17, 1  ;;  %v632_v33 = vor.u32 %v631_v20, %v627_v19  ;;  %v217_v37 = vld [vmem:[%s3073_s24 + $0x2c] sm:$0x1]  ;;  %v2688_v17 = vld [vmem:[%s3073_s24 + $0x30] sm:$0xe] }
  0x5c   : > { %v653_v19 = vshll.u32 %v2198_v61, 16 }
  0x5d   : > { %1918 = vmatpush.bf16.msra.mxu3 %v2611_v40  ;;  %1967 = vmatpush.bf16.msra.mxu0 %v2619_v41  ;;  %v636_v36 = vrot.slane %v634_v21, 1  ;;  %v404_v39 = vsel %vm368_vm0, %v620_v62, %v403_v22  ;;  %v506_v40 = vsel %vm497_vm1, %v504_v27, %v505_v32  ;;  %v355_v41 = vunpack.c.l.b16 %v217_v37  ;;  %v3338_v62 = vld [vmem:[%s3073_s24 + $0x3c] sm:$0xf0] }
  0x5e   : > { %v651_v22 = vshrl.u32 %v2198_v61, 16  ;;  %v655_v27 = vrot.slane %v653_v19, 1  ;;  %v2690_v19 = vld [vmem:[%s3073_s24 + $0x48] sm:$0xf0] }
  0x5f   : > { %1870 = vmatpush.bf16.msra.mxu2 %v2602_v46  ;;  %1821 = vmatpush.bf16.msra.mxu1 %v2594_v34  ;;  %v637_v42 = vsel %vm368_vm0, %v632_v33, %v636_v36  ;;  %v363_v46 = vpack.c.b16 %v355_v41, %v355_v41  ;;  %v408_v34 = vshll.u32 %v3125_v23, 16  ;;  %v218_v23 = vld [vmem:[%s3073_s24 + $0x38] sm:$0x1]  ;;  %v2211_v41 = vld [vmem:[%s3073_s24 + $0x50] sm:$0x1] }
  0x60   : > { %v356_v6 = vunpack.c.l.b16 %v218_v23  ;;  %v656_v38 = vor.u32 %v655_v27, %v651_v22  ;;  %v2589_v27 = vld [vmem:[%s3721_s1 + $0x140] sm:$0xff] }
  0x61   : > { %1919 = vmatpush.bf16.msra.mxu3 %v2610_v47  ;;  %1968 = vmatpush.bf16.msra.mxu0 %v2618_v48  ;;  %v2600_v47 = vld [vmem:[%s3721_s1 + $0x198] sm:$0xff]  ;;  %v410_v54 = vrot.slane %v408_v34, 1  ;;  %v413_v56 = vshll.u32 %v363_v46, 16 }
  0x62   : > { %v2608_v48 = vld [vmem:[%s3721_s1 + $0x1d8] sm:$0xff] }
  0x63   : > { %1871 = vmatpush.bf16.msra.mxu2 %v2601_v7  ;;  %1822 = vmatpush.bf16.msra.mxu1 %v2593_v9  ;;  %v411_v31 = vor.u32 %v410_v54, %v406_v53  ;;  %v415_v63 = vrot.slane %v413_v56, 1  ;;  %v364_v9 = vpack.c.b16 %v356_v6, %v356_v6  ;;  %v2824_v34 = vld [vmem:[%s3073_s24 + $0x3c] sm:$0xe]  ;;  %v444_v53 = vshll.u32 %v3091_v13, 16  ;;  %v2212_v6 = vld [vmem:[%s3073_s24 + $0x5c] sm:$0x1] }
  0x64   : > { %v430_v56 = vshrl.u32 %v3131_v25, 16 }
  0x65   : > { %1920 = vmatpush.bf16.msra.mxu3 %v2609_v8  ;;  %v425_v20 = vshll.u32 %v364_v9, 16  ;;  %v511_v37 = vrot.slane %v364_v9, 1 }
  0x66   : > { %1636 = vmatmul.bf16.gmra.mxu1 %v392_v1  ;;  %1685 = vmatmul.bf16.gmra.mxu2 %v503_v2  ;;  %v508_v1 = vrot.slane %v363_v46, 1  ;;  %v644_v2 = vor.u32 %v422_v30, %v418_v59  ;;  %v2825_v30 = vor.u32 %v2824_v34, %v3134_v26 }
  0x67   : > { %1872 = vmatpush.bf16.msra.mxu2 %v2600_v47  ;;  %1823 = vmatpush.bf16.msra.mxu1 %v2592_v49  ;;  %v427_v33 = vrot.slane %v425_v20, 1  ;;  %v591_v47 = vunpack.c.l.b16 %v2211_v41  ;;  %v432_v49 = vshll.u32 %v3131_v25, 16  ;;  %v2614_v25 = vld [vmem:[%s3721_s1 + $0x208] sm:$0xff] }
  0x68   : > { %1734 = vmatmul.bf16.gmra.mxu3 %v3082_v10  ;;  %1783 = vmatmul.bf16.gmra.mxu0 %v625_v4  ;;  %v2617_v10 = vld [vmem:[%s3721_s1 + $0x220] sm:$0xff]  ;;  %v649_v7 = vsel %vm368_vm0, %v644_v2, %v648_v3  ;;  %v513_v3 = vrot.slane %v2825_v30, 1 }
  0x69   : > { %1969 = vmatpush.bf16.msra.mxu0 %v2617_v10  ;;  %1921 = vmatpush.bf16.msra.mxu3 %v2608_v48  ;;  %v2210_v4 = vld [vmem:[%s3073_s24 + $0x44] sm:$0x1]  ;;  %v2687_v10 = vld [vmem:[%s3073_s24 + $0x30] sm:$0xf0]  ;;  %v3377_v54 = vpack.c.b16 %v591_v47, %v591_v47  ;;  %v3433_v30 = vld [vmem:[%s3722_s2] ss:$0 sm:$0xff] }
  0x6a   : > { %v590_v8 = vunpack.c.l.b16 %v2210_v4  ;;  %v2689_v21 = vor.u32 %v2688_v17, %v2687_v10  ;;  %v2597_v10 = vld [vmem:[%s3721_s1 + $0x180] sm:$0xff] }
  0x6b   : > { %1873 = vmatpush.bf16.msra.mxu2 %v2599_v12  ;;  %1824 = vmatpush.bf16.msra.mxu1 %v2591_v16  ;;  %v2605_v17 = vld [vmem:[%s3721_s1 + $0x1c0] sm:$0xff] }
  0x6c   : > { %v3357_v18 = vpack.c.b16 %v590_v8, %v590_v8  ;;  %v510_v36 = vrot.slane %v2689_v21, 1 }
  0x6d   : > { %1970 = vmatpush.bf16.msra.mxu0 %v2616_v52  ;;  %1922 = vmatpush.bf16.msra.mxu3 %v2607_v14  ;;  %v2606_v52 = vld [vmem:[%s3721_s1 + $0x1c8] sm:$0xff]  ;;  %v592_v14 = vunpack.c.l.b16 %v2212_v6 }
  0x6e   : > { %v658_v32 = vshll.u32 %v3357_v18, 16 }
  0x6f   : > { %1874 = vmatpush.bf16.msra.mxu2 %v2598_v50  ;;  %1825 = vmatpush.bf16.msra.mxu1 %v2590_v60  ;;  %v3407_v20 = vpack.c.b16 %v592_v14, %v592_v14 }
  0x71   : > { %1923 = vmatpush.bf16.msra.mxu3 %v2606_v52  ;;  %v2827_v52 = vld [vmem:[%s3073_s24 + $0x54] sm:$0xe] }
  0x73   : > { %1875 = vmatpush.bf16.msra.mxu2 %v2597_v10  ;;  %1826 = vmatpush.bf16.msra.mxu1 %v2589_v27  ;;  %v2830_v27 = vld [vmem:[%s3073_s24 + $0xc] sm:$0xe] }
  0x75   : > { %1924 = vmatpush.bf16.msra.mxu3 %v2605_v17  ;;  %v2238_v17 = vld [vmem:[%s3073_s24 + $0x20] sm:$0x1] }
  0x76   : > { %1641 = vmatmul.bf16.gmra.mxu1 %v404_v39  ;;  %1690 = vmatmul.bf16.gmra.mxu2 %v506_v40  ;;  %v660_v39 = vrot.slane %v658_v32, 1  ;;  %v219_v40 = vld [vmem:[%s3073_s24 + $0x44] sm:$0x1] }
  0x77   : > { %v357_v44 = vunpack.c.l.b16 %v219_v40 }
  0x78   : > { %1739 = vmatmul.bf16.gmra.mxu3 %v2194_v57  ;;  %1788 = vmatmul.bf16.gmra.mxu0 %v637_v42  ;;  %v2822_v57 = vor.u32 %v2821_v43, %v3128_v24  ;;  %v416_v24 = vsel %vm368_vm0, %v411_v31, %v415_v63  ;;  %v428_v42 = vsel %vm368_vm0, %v644_v2, %v427_v33  ;;  %v446_v31 = vrot.slane %v444_v53, 1 }
  0x79   : > { %v512_v43 = vsel %vm497_vm1, %v510_v36, %v511_v37  ;;  %v661_v46 = vsel %vm368_vm0, %v656_v38, %v660_v39  ;;  %v365_v48 = vpack.c.b16 %v357_v44, %v357_v44  ;;  %v670_v63 = vshll.u32 %v3377_v54, 16  ;;  %v2613_v37 = vld [vmem:[%s3721_s1 + $0x200] sm:$0xff]  ;;  %v2213_v44 = vld [vmem:[%s3073_s24 + $0x68] sm:$0x1] }
  0x7a   : > { %v507_v0 = vrot.slane %v2822_v57, 1  ;;  %v434_v57 = vrot.slane %v432_v49, 1  ;;  %v682_v36 = vshll.u32 %v3407_v20, 16  ;;  %v593_v53 = vunpack.c.l.b16 %v2213_v44 }
  0x7b   : > { %v437_v59 = vshll.u32 %v365_v48, 16  ;;  %v514_v23 = vrot.slane %v365_v48, 1 }
  0x7c   : > { %v509_v5 = vsel %vm497_vm1, %v507_v0, %v508_v1  ;;  %v2202_v0 = vld [vmem:[%s3073_s24 + $0x54] sm:$0xff]   ;;  %v435_v26 = vor.u32 %v434_v57, %v430_v56  ;;  %v3427_v56 = vld [vmem:[%s3073_s24 + $0x60] sm:$0xff]  }
  0x7d   : > { %v3388_v1 = vld [vmem:[%s3073_s24 + $0x54] sm:$0xf0]  ;;  %v439_v2 = vrot.slane %v437_v59, 1  ;;  %v515_v8 = vsel %vm497_vm1, %v513_v3, %v514_v23  ;;  %v677_v21 = vshll.u32 %v2202_v0, 16  ;;  %v675_v32 = vshrl.u32 %v2202_v0, 16 }
  0x7e   : > { %v456_v59 = vshll.u32 %v3140_v28, 16  ;;  %v689_v60 = vshll.u32 %v3427_v56, 16 }
  0x7f   : > { %v679_v33 = vrot.slane %v677_v21, 1 }
  0x80   : > { %v458_v3 = vrot.slane %v456_v59, 1  ;;  %v691_v6 = vrot.slane %v689_v60, 1  ;;  %v3486_v60 = vld [vmem:[%s3073_s24 + $0x24] sm:$0xff]  }
  0x81   : > { %v680_v41 = vor.u32 %v679_v33, %v675_v32 }
  0x86   : > { %1646 = vmatmul.bf16.gmra.mxu1 %v416_v24  ;;  %1695 = vmatmul.bf16.gmra.mxu2 %v509_v5  ;;  %v672_v24 = vrot.slane %v670_v63, 1  ;;  %v220_v5 = vld [vmem:[%s3073_s24 + $0x50] sm:$0x1] }
  0x87   : > { %v358_v9 = vunpack.c.l.b16 %v220_v5  ;;  %v687_v5 = vshrl.u32 %v3427_v56, 16 }
  0x88   : > { %1744 = vmatmul.bf16.gmra.mxu3 %v3085_v11  ;;  %1793 = vmatmul.bf16.gmra.mxu0 %v649_v7  ;;  %v2615_v11 = vld [vmem:[%s3721_s1 + $0x210] sm:$0xff]  ;;  %v440_v7 = vsel %vm368_vm0, %v435_v26, %v439_v2 }
  0x89   : > { %1971 = vmatpush.bf16.msra.mxu0 %v2615_v11  ;;  %v366_v16 = vpack.c.b16 %v358_v9, %v358_v9  ;;  %v2691_v11 = vld [vmem:[%s3073_s24 + $0x48] sm:$0xe]  ;;  %v3452_v14 = vor.u32 %v691_v6, %v687_v5  ;;  %v2239_v6 = vld [vmem:[%s3073_s24 + $0x2c] sm:$0x1] }
  0x8a   : > { %v2692_v22 = vor.u32 %v2691_v11, %v2690_v19 }
  0x8b   : > { %v517_v40 = vrot.slane %v366_v16, 1 }
  0x8c   : > { %v516_v39 = vrot.slane %v2692_v22, 1 }
  0x8d   : > { %1972 = vmatpush.bf16.msra.mxu0 %v2614_v25 }
  0x8e   : > { %v518_v47 = vsel %vm497_vm1, %v516_v39, %v517_v40 }
  0x91   : > { %1973 = vmatpush.bf16.msra.mxu0 %v2613_v37  ;;  %v2677_v37 = vld [vmem:[%s3073_s24 + $0x18] sm:$0xff]  }
  0x96   : > { %1651 = vmatmul.bf16.gmra.mxu1 %v428_v42  ;;  %1700 = vmatmul.bf16.gmra.mxu2 %v512_v43  ;;  %v684_v42 = vrot.slane %v682_v36, 1  ;;  %v221_v43 = vld [vmem:[%s3073_s24 + $0x5c] sm:$0x1]  ;;  %v818_v36 = vunpack.c.l.b16 %v2238_v17 }
  0x97   : > { %v359_v48 = vunpack.c.l.b16 %v221_v43 }
  0x98   : > { %1749 = vmatmul.bf16.gmra.mxu3 %v2198_v61  ;;  %1798 = vmatmul.bf16.gmra.mxu0 %v661_v46  ;;  %v442_v61 = vshrl.u32 %v3091_v13, 16  ;;  %v685_v50 = vsel %vm368_vm0, %v680_v41, %v684_v42  ;;  %v826_v39 = vpack.c.b16 %v818_v36, %v818_v36  ;;  %v2705_v41 = vld [vmem:[%s3073_s24 + $0x18] sm:$0xf0]  ;;  %v2706_v42 = vld [vmem:[%s3073_s24 + $0x18] sm:$0xe] }
  0x99   : > { %v367_v57 = vpack.c.b16 %v359_v48, %v359_v48  ;;  %v2707_v59 = vor.u32 %v2706_v42, %v2705_v41 }
  0x9a   : > { %v668_v4 = vor.u32 %v446_v31, %v442_v61  ;;  %v3436_v61 = vpack.c.b16 %v593_v53, %v593_v53 }
  0x9b   : > { %v461_v23 = vshll.u32 %v367_v57, 16 }
  0x9c   : > { %v673_v12 = vsel %vm368_vm0, %v668_v4, %v672_v24 }
  0xa6   : > { %1656 = vmatmul.bf16.gmra.mxu1 %v440_v7  ;;  %1705 = vmatmul.bf16.gmra.mxu2 %v515_v8  ;;  %v694_v7 = vshll.u32 %v3436_v61, 16 }
  0xa8   : > { %1754 = vmatmul.bf16.gmra.mxu3 %v3091_v13  ;;  %1803 = vmatmul.bf16.gmra.mxu0 %v673_v12  ;;  %v449_v13 = vshll.u32 %v366_v16, 16  ;;  %v520_v12 = vrot.slane %v367_v57, 1  ;;  %v696_v16 = vrot.slane %v694_v7, 1  ;;  %v842_v57 = vshll.u32 %v826_v39, 16 }
  0xaa   : > { %v451_v38 = vrot.slane %v449_v13, 1  ;;  %v697_v33 = vsel %vm368_vm0, %v3452_v14, %v696_v16 }
  0xac   : > { %v452_v34 = vsel %vm368_vm0, %v668_v4, %v451_v38  ;;  %v2828_v4 = vor.u32 %v2827_v52, %v3143_v29  ;;  %v837_v38 = vshll.u32 %v2677_v37, 16  ;;  %v835_v52 = vshrl.u32 %v2677_v37, 16 }
  0xae   : > { %v519_v9 = vrot.slane %v2828_v4, 1  ;;  %v839_v53 = vrot.slane %v837_v38, 1  ;;  %v963_v4 = vrot.slane %v826_v39, 1 }
  0xb0   : > { %v521_v22 = vsel %vm497_vm1, %v519_v9, %v520_v12 }
  0xb3   : > { %v3418_v46 = vpop.f32.mrf.mxu1 }
  0xb5   : > { %v3422_v49 = vpop.f32.mrf.mxu0 }
  0xb6   : > { %1661 = vmatmul.bf16.gmra.mxu1 %v452_v34  ;;  %1710 = vmatmul.bf16.gmra.mxu2 %v518_v47  ;;  %v2831_v34 = vor.u32 %v2830_v27, %v3161_v35  ;;  %v844_v35 = vrot.slane %v842_v57, 1  ;;  %v1584_v7 = vadd.f32 %v3433_v30, %v3422_v49  ;;  %v2833_v49 = vld [vmem:[%s3073_s24 + $0x24] sm:$0xe]  ;;  %v2693_v27 = vld [vmem:[%s3073_s24 + $0x18] sm:$0xf0] }
  0xb8   : > { %1759 = vmatmul.bf16.gmra.mxu3 %v2202_v0  ;;  %1808 = vmatmul.bf16.gmra.mxu0 %v685_v50  ;;  %v454_v0 = vshrl.u32 %v3140_v28, 16  ;;  %v463_v28 = vrot.slane %v461_v23, 1  ;;  %v962_v23 = vrot.slane %v2707_v59, 1 }
  0xb9   : > { %v1603_v31 = vpop.f32.mrf.mxu2 }
  0xba   : > { %v3439_v63 = vadd.f32 %v3433_v30, %v1603_v31  ;;  %v459_v8 = vor.u32 %v458_v3, %v454_v0  ;;  %v2832_v31 = vld [vmem:[%s3073_s24 + $0x24] sm:$0xf0]  ;;  %v731_v0 = vrot.slane %v3203_v55, 1  ;;  %v840_v3 = vor.u32 %v839_v53, %v835_v52 }
  0xbb   : > { %v1613_v25 = vpop.f32.mrf.mxu3  ;;  %v3445_v2 = vpop.f32.mrf.mxu1 }
  0xbc   : > { %v3443_v26 = vadd.f32 %v3433_v30, %v1613_v25  ;;  %v464_v13 = vsel %vm368_vm0, %v459_v8, %v463_v28  ;;  %v730_v25 = vrot.slane %v2831_v34, 1  ;;  %v845_v17 = vsel %vm368_vm0, %v840_v3, %v844_v35 }
  0xbd   : > { %v3448_v24 = vpop.f32.mrf.mxu0  ;;  %v847_v34 = vshrl.u32 %v3486_v60, 16  ;;  %v734_v35 = vrot.slane %v3265_v45, 1 }
  0xbe   : > { %v732_v12 = vsel %vm497_vm1, %v730_v25, %v731_v0  ;;  %v1586_v39 = vadd.f32 %v3433_v30, %v3448_v24  ;;  %v2834_v25 = vor.u32 %v2833_v49, %v2832_v31 }
  0xc1   : > { %v1605_v10 = vpop.f32.mrf.mxu2 }
  0xc2   : > { %v3456_v29 = vadd.f32 %v3433_v30, %v1605_v10 }
  0xc3   : > { %v1615_v19 = vpop.f32.mrf.mxu3  ;;  %v3461_v21 = vpop.f32.mrf.mxu1 }
  0xc4   : > { %v3459_v11 = vadd.f32 %v3433_v30, %v1615_v19  ;;  %v964_v19 = vsel %vm497_vm1, %v962_v23, %v963_v4  ;;  %v965_v4 = vrot.slane %v2834_v25, 1 }
  0xc5   : > { %v3466_v32 = vpop.f32.mrf.mxu0 }
  0xc6   : > { %1666 = vmatmul.bf16.gmra.mxu1 %v464_v13  ;;  %1715 = vmatmul.bf16.gmra.mxu2 %v521_v22  ;;  %v819_v13 = vunpack.c.l.b16 %v2239_v6  ;;  %v849_v22 = vshll.u32 %v3486_v60, 16  ;;  %v2240_v6 = vld [vmem:[%s3073_s24 + $0x38] sm:$0x1] }
  0xc8   : > { %1764 = vmatmul.bf16.gmra.mxu3 %v3427_v56  ;;  %1813 = vmatmul.bf16.gmra.mxu0 %v697_v33  ;;  %v2694_v33 = vld [vmem:[%s3073_s24 + $0x18] sm:$0xe]  ;;  %v827_v36 = vpack.c.b16 %v819_v13, %v819_v13  ;;  %v851_v52 = vrot.slane %v849_v22, 1 }
  0xc9   : > { %v1608_v40 = vpop.f32.mrf.mxu2 }
  0xca   : > { %v3475_v43 = vadd.f32 %v3433_v30, %v1608_v40  ;;  %v854_v59 = vshll.u32 %v827_v36, 16  ;;  %v852_v24 = vor.u32 %v851_v52, %v847_v34 }
  0xcb   : > { %v1618_v44 = vpop.f32.mrf.mxu3  ;;  %v3481_v48 = vpop.f32.mrf.mxu1 }
  0xcc   : > { %v3479_v47 = vadd.f32 %v3433_v30, %v1618_v44  ;;  %v2695_v44 = vor.u32 %v2694_v33, %v2693_v27  ;;  %v856_v23 = vrot.slane %v854_v59, 1  ;;  %v2678_v27 = vld [vmem:[%s3073_s24 + $0x30] sm:$0xff]  }
  0xcd   : > { %v3483_v50 = vpop.f32.mrf.mxu0  ;;  %v861_v33 = vshll.u32 %v2678_v27, 16 }
  0xce   : > { %v733_v3 = vrot.slane %v2695_v44, 1  ;;  %v857_v49 = vsel %vm368_vm0, %v852_v24, %v856_v23  ;;  %v2838_v24 = vld [vmem:[%s3073_s24 + $0x3c] sm:$0xf0] }
  0xd0   : > { %v735_v31 = vsel %vm497_vm1, %v733_v3, %v734_v35  ;;  %v3529_v35 = vld [vmem:[%s3073_s24 + $0x3c] sm:$0xff]  }
  0xd1   : > { %v1610_v5 = vpop.f32.mrf.mxu2 }
  0xd2   : > { %v3494_v8 = vadd.f32 %v3433_v30, %v1610_v5  ;;  %v966_v5 = vrot.slane %v827_v36, 1 }
  0xd3   : > { %v1620_v28 = vpop.f32.mrf.mxu3  ;;  %v1632_v55 = vpop.f32.mrf.mxu1 }
  0xd4   : > { %v3497_v9 = vadd.f32 %v3433_v30, %v1620_v28  ;;  %v1633_v16 = vadd.f32 %v1632_v55, %v1584_v7  ;;  %v1589_v28 = vadd.f32 %v3433_v30, %v3466_v32  ;;  %v967_v22 = vsel %vm497_vm1, %v965_v4, %v966_v5 }
  0xd5   : > { %v1779_v10 = vpop.f32.mrf.mxu0  ;;  %v737_v4 = vrot.slane %v3304_v15, 1 }
  0xd6   : > { %1827 = vmatmul.bf16.vlgmr.msra.gmra.mxu1 %v732_v12  ;;  %1876 = vmatmul.bf16.vlgmr.msra.gmra.mxu2 %v2677_v37 }
  0xd8   : > { %1925 = vmatmul.bf16.vlgmr.msra.gmra.mxu3 %v845_v17  ;;  %1974 = vmatmul.bf16.vlgmr.msra.gmra.mxu0 %v964_v19  ;;  %v820_v17 = vunpack.c.l.b16 %v2240_v6 }
  0xd9   : > { %v1681_v38 = vpop.f32.mrf.mxu2 }
  0xda   : > { %v1682_v40 = vadd.f32 %v1681_v38, %v1633_v16  ;;  %v828_v36 = vpack.c.b16 %v820_v17, %v820_v17 }
  0xdb   : > { %v1730_v41 = vpop.f32.mrf.mxu3  ;;  %v1634_v42 = vpop.f32.mrf.mxu1 }
  0xdc   : > { %v1731_v37 = vadd.f32 %v1730_v41, %v1682_v40  ;;  %v1635_v53 = vadd.f32 %v1634_v42, %v1586_v39  ;;  %v2708_v39 = vld [vmem:[%s3073_s24 + $0x30] sm:$0xf0]  ;;  %v2709_v40 = vld [vmem:[%s3073_s24 + $0x30] sm:$0xe]  ;;  %v1591_v41 = vadd.f32 %v3433_v30, %v3483_v50 }
  0xdd   : > { %v1781_v57 = vpop.f32.mrf.mxu0  ;;  %v2710_v3 = vor.u32 %v2709_v40, %v2708_v39  ;;  %v2697_v39 = vld [vmem:[%s3073_s24 + $0x30] sm:$0xe] }
  0xde   : > { %v3509_v0 = vadd.f32 %v1779_v10, %v1731_v37  ;;  %v2836_v10 = vld [vmem:[%s3073_s24 + $0x24] sm:$0xe]  ;;  %v863_v37 = vrot.slane %v861_v33, 1  ;;  %v2839_v33 = vld [vmem:[%s3073_s24 + $0x3c] sm:$0xe] }
  0xdf   : > { %v2837_v34 = vor.u32 %v2836_v10, %v3285_v58  ;;  %v968_v58 = vrot.slane %v2710_v3, 1  ;;  %v2840_v3 = vor.u32 %v2839_v33, %v2838_v24 }
  0xe1   : > { %v1683_v7 = vpop.f32.mrf.mxu2  ;;  %v736_v23 = vrot.slane %v2837_v34, 1 }
  0xe2   : > { %v1684_v55 = vadd.f32 %v1683_v7, %v1635_v53  ;;  %v866_v53 = vshll.u32 %v828_v36, 16  ;;  %v969_v7 = vrot.slane %v828_v36, 1 }
  0xe3   : > { %v1732_v12 = vpop.f32.mrf.mxu3  ;;  %v1637_v16 = vpop.f32.mrf.mxu1  ;;  %v738_v17 = vsel %vm497_vm1, %v736_v23, %v737_v4 }
  0xe4   : > { %v1733_v45 = vadd.f32 %v1732_v12, %v1684_v55  ;;  %v1638_v19 = vadd.f32 %v1637_v16, %v1589_v28  ;;  %v868_v6 = vrot.slane %v866_v53, 1  ;;  %v2241_v55 = vld [vmem:[%s3073_s24 + $0x44] sm:$0x1]  ;;  %v1594_v12 = vadd.f32 %v3433_v30, %v3418_v46 }
  0xe5   : > { %v1784_v13 = vpop.f32.mrf.mxu0  ;;  %v873_v46 = vshll.u32 %v3529_v35, 16 }
  0xe6   : > { %1832 = vmatmul.bf16.gmra.mxu1 %v735_v31  ;;  %1881 = vmatmul.bf16.gmra.mxu2 %v3486_v60  ;;  %v3521_v32 = vadd.f32 %v1781_v57, %v1733_v45  ;;  %v859_v60 = vshrl.u32 %v2678_v27, 16 }
  0xe8   : > { %1930 = vmatmul.bf16.gmra.mxu3 %v857_v49  ;;  %1979 = vmatmul.bf16.gmra.mxu0 %v967_v22  ;;  %v864_v5 = vor.u32 %v863_v37, %v859_v60  ;;  %v970_v49 = vsel %vm497_vm1, %v968_v58, %v969_v7  ;;  %v821_v22 = vunpack.c.l.b16 %v2241_v55  ;;  %v875_v37 = vrot.slane %v873_v46, 1 }
  0xe9   : > { %v1686_v38 = vpop.f32.mrf.mxu2  ;;  %v971_v58 = vrot.slane %v2840_v3, 1  ;;  %v2844_v3 = vld [vmem:[%s3073_s24 + $0x54] sm:$0xf0] }
  0xea   : > { %v1687_v42 = vadd.f32 %v1686_v38, %v1638_v19  ;;  %v869_v15 = vsel %vm368_vm0, %v864_v5, %v868_v6  ;;  %v2696_v38 = vld [vmem:[%s3073_s24 + $0x30] sm:$0xf0]  ;;  %v829_v40 = vpack.c.b16 %v821_v22, %v821_v22  ;;  %v740_v5 = vrot.slane %v3327_v51, 1  ;;  %v2679_v22 = vld [vmem:[%s3073_s24 + $0x48] sm:$0xff]  }
  0xeb   : > { %v1735_v44 = vpop.f32.mrf.mxu3  ;;  %v1639_v52 = vpop.f32.mrf.mxu1  ;;  %v2698_v60 = vor.u32 %v2697_v39, %v2696_v38  ;;  %v885_v33 = vshll.u32 %v2679_v22, 16  ;;  %v2711_v39 = vld [vmem:[%s3073_s24 + $0x48] sm:$0xf0] }
  0xec   : > { %v1736_v57 = vadd.f32 %v1735_v44, %v1687_v42  ;;  %v1640_v59 = vadd.f32 %v1639_v52, %v1591_v41  ;;  %v1596_v42 = vadd.f32 %v3433_v30, %v3445_v2  ;;  %v972_v7 = vrot.slane %v829_v40, 1 }
  0xed   : > { %v1786_v25 = vpop.f32.mrf.mxu0  ;;  %v739_v4 = vrot.slane %v2698_v60, 1  ;;  %v887_v60 = vrot.slane %v885_v33, 1 }
  0xee   : > { %v3533_v50 = vadd.f32 %v1784_v13, %v1736_v57 }
  0xef   : > { %v741_v24 = vsel %vm497_vm1, %v739_v4, %v740_v5  ;;  %v743_v5 = vrot.slane %v3357_v18, 1 }
  0xf1   : > { %v1688_v28 = vpop.f32.mrf.mxu2 }
  0xf2   : > { %v1689_v16 = vadd.f32 %v1688_v28, %v1640_v59  ;;  %v2242_v28 = vld [vmem:[%s3073_s24 + $0x50] sm:$0x1] }
  0xf3   : > { %v1737_v31 = vpop.f32.mrf.mxu3  ;;  %v1642_v10 = vpop.f32.mrf.mxu1 }
  0xf4   : > { %v1738_v45 = vadd.f32 %v1737_v31, %v1689_v16  ;;  %v1643_v19 = vadd.f32 %v1642_v10, %v1594_v12  ;;  %v1599_v12 = vadd.f32 %v3433_v30, %v3461_v21 }
  0xf5   : > { %v1789_v13 = vpop.f32.mrf.mxu0 }
  0xf6   : > { %1837 = vmatmul.bf16.gmra.mxu1 %v738_v17  ;;  %1886 = vmatmul.bf16.gmra.mxu2 %v2678_v27  ;;  %v3542_v36 = vadd.f32 %v1786_v25, %v1738_v45  ;;  %v871_v27 = vshrl.u32 %v3529_v35, 16  ;;  %v878_v25 = vshll.u32 %v829_v40, 16  ;;  %v2842_v17 = vld [vmem:[%s3073_s24 + $0x3c] sm:$0xe]  ;;  %v2712_v40 = vld [vmem:[%s3073_s24 + $0x48] sm:$0xe] }
  0xf8   : > { %1935 = vmatmul.bf16.gmra.mxu3 %v869_v15  ;;  %1984 = vmatmul.bf16.gmra.mxu0 %v970_v49  ;;  %v876_v2 = vor.u32 %v875_v37, %v871_v27  ;;  %v880_v6 = vrot.slane %v878_v25, 1  ;;  %v822_v15 = vunpack.c.l.b16 %v2242_v28  ;;  %v973_v49 = vsel %vm497_vm1, %v971_v58, %v972_v7  ;;  %v3570_v25 = vld [vmem:[%s3073_s24 + $0x54] sm:$0xff]   ;;  %v2243_v7 = vld [vmem:[%s3073_s24 + $0x5c] sm:$0x1] }
  0xf9   : > { %v1691_v41 = vpop.f32.mrf.mxu2 }
  0xfa   : > { %v1692_v44 = vadd.f32 %v1691_v41, %v1643_v19  ;;  %v830_v46 = vpack.c.b16 %v822_v15, %v822_v15  ;;  %v1601_v41 = vadd.f32 %v3433_v30, %v3481_v48  ;;  %v823_v15 = vunpack.c.l.b16 %v2243_v7 }
  0xfb   : > { %v1740_v34 = vpop.f32.mrf.mxu3  ;;  %v1644_v52 = vpop.f32.mrf.mxu1 }
  0xfc   : > { %v1741_v53 = vadd.f32 %v1740_v34, %v1692_v44  ;;  %v1645_v57 = vadd.f32 %v1644_v52, %v1596_v42  ;;  %v2843_v34 = vor.u32 %v2842_v17, %v3338_v62  ;;  %v890_v27 = vshll.u32 %v830_v46, 16 }
  0xfd   : > { %v1791_v59 = vpop.f32.mrf.mxu0  ;;  %v831_v33 = vpack.c.b16 %v823_v15, %v823_v15 }
  0xfe   : > { %v3550_v23 = vadd.f32 %v1789_v13, %v1741_v53  ;;  %v881_v13 = vsel %vm368_vm0, %v876_v2, %v880_v6  ;;  %v742_v4 = vrot.slane %v2843_v34, 1  ;;  %v892_v62 = vrot.slane %v890_v27, 1 }
  0xff   : > { %v975_v6 = vrot.slane %v830_v46, 1 }
 0x101   : > { %v1693_v55 = vpop.f32.mrf.mxu2 }
 0x102   : > { %v1694_v16 = vadd.f32 %v1693_v55, %v1645_v57 }
 0x103   : > { %v1742_v31 = vpop.f32.mrf.mxu3  ;;  %v1647_v10 = vpop.f32.mrf.mxu1 }
 0x104   : > { %v1743_v51 = vadd.f32 %v1742_v31, %v1694_v16  ;;  %v1648_v45 = vadd.f32 %v1647_v10, %v1599_v12  ;;  %v744_v16 = vsel %vm497_vm1, %v742_v4, %v743_v5  ;;  %v978_v4 = vrot.slane %v831_v33, 1  ;;  %v2244_v5 = vld [vmem:[%s3073_s24 + $0x68] sm:$0x1] }
 0x105   : > { %v1794_v19 = vpop.f32.mrf.mxu0 }
 0x106   : > { %1842 = vmatmul.bf16.gmra.mxu1 %v741_v24  ;;  %1891 = vmatmul.bf16.gmra.mxu2 %v3529_v35  ;;  %v3562_v21 = vadd.f32 %v1791_v59, %v1743_v51  ;;  %v883_v35 = vshrl.u32 %v2679_v22, 16  ;;  %v2713_v59 = vor.u32 %v2712_v40, %v2711_v39  ;;  %v2845_v51 = vld [vmem:[%s3073_s24 + $0x54] sm:$0xe] }
 0x108   : > { %1940 = vmatmul.bf16.gmra.mxu3 %v881_v13  ;;  %1989 = vmatmul.bf16.gmra.mxu0 %v973_v49  ;;  %v888_v48 = vor.u32 %v887_v60, %v883_v35  ;;  %v974_v2 = vrot.slane %v2713_v59, 1  ;;  %v2699_v13 = vld [vmem:[%s3073_s24 + $0x48] sm:$0xf0]  ;;  %v2700_v49 = vld [vmem:[%s3073_s24 + $0x48] sm:$0xe]  ;;  %v2846_v35 = vor.u32 %v2845_v51, %v2844_v3  ;;  %v824_v3 = vunpack.c.l.b16 %v2244_v5 }
 0x109   : > { %v1696_v38 = vpop.f32.mrf.mxu2  ;;  %v2701_v40 = vor.u32 %v2700_v49, %v2699_v13 }
 0x10a   : > { %v1697_v42 = vadd.f32 %v1696_v38, %v1648_v45  ;;  %v893_v31 = vsel %vm368_vm0, %v888_v48, %v892_v62  ;;  %v976_v17 = vsel %vm497_vm1, %v974_v2, %v975_v6  ;;  %v977_v59 = vrot.slane %v2846_v35, 1 }
 0x10b   : > { %v1745_v44 = vpop.f32.mrf.mxu3  ;;  %v1649_v52 = vpop.f32.mrf.mxu1  ;;  %v745_v27 = vrot.slane %v2701_v40, 1  ;;  %v749_v40 = vrot.slane %v3407_v20, 1 }
 0x10c   : > { %v1746_v37 = vadd.f32 %v1745_v44, %v1697_v42  ;;  %v1650_v53 = vadd.f32 %v1649_v52, %v1601_v41  ;;  %v895_v41 = vshrl.u32 %v3570_v25, 16  ;;  %v902_v52 = vshll.u32 %v831_v33, 16 }
 0x10d   : > { %v1796_v57 = vpop.f32.mrf.mxu0 }
 0x10e   : > { %v3574_v30 = vadd.f32 %v1794_v19, %v1746_v37  ;;  %v897_v19 = vshll.u32 %v3570_v25, 16  ;;  %v746_v37 = vrot.slane %v3377_v54, 1 }
 0x110   : > { %v899_v42 = vrot.slane %v897_v19, 1 }
 0x111   : > { %v1698_v58 = vpop.f32.mrf.mxu2 }
 0x112   : > { %v1699_v28 = vadd.f32 %v1698_v58, %v1650_v53  ;;  %v900_v53 = vor.u32 %v899_v42, %v895_v41  ;;  %v2848_v58 = vld [vmem:[%s3073_s24 + $0x54] sm:$0xe] }
 0x113   : > { %v1747_v55 = vpop.f32.mrf.mxu3  ;;  %v1652_v12 = vpop.f32.mrf.mxu1  ;;  %v2849_v15 = vor.u32 %v2848_v58, %v3388_v1 }
 0x114   : > { %v1748_v10 = vadd.f32 %v1747_v55, %v1699_v28  ;;  %v1653_v18 = vadd.f32 %v1652_v12, %v3439_v63  ;;  %v979_v12 = vsel %vm497_vm1, %v977_v59, %v978_v4  ;;  %v2851_v4 = vld [vmem:[%s3073_s24 + $0x6c] sm:$0xe] }
 0x115   : > { %v1799_v24 = vpop.f32.mrf.mxu0 }
 0x116   : > { %1847 = vmatmul.bf16.gmra.mxu1 %v744_v16  ;;  %1896 = vmatmul.bf16.gmra.mxu2 %v2679_v22  ;;  %v3582_v45 = vadd.f32 %v1796_v57, %v1748_v10  ;;  %v904_v57 = vrot.slane %v902_v52, 1 }
 0x118   : > { %1945 = vmatmul.bf16.gmra.mxu3 %v893_v31  ;;  %1994 = vmatmul.bf16.gmra.mxu0 %v976_v17  ;;  %v905_v54 = vsel %vm368_vm0, %v900_v53, %v904_v57  ;;  %v832_v31 = vpack.c.b16 %v824_v3, %v824_v3 }
 0x119   : > { %v1701_v46 = vpop.f32.mrf.mxu2 }
 0x11a   : > { %v1702_v38 = vadd.f32 %v1701_v46, %v1653_v18  ;;  %v2714_v18 = vld [vmem:[%s3073_s24 + $0x60] sm:$0xf0]  ;;  %v914_v19 = vshll.u32 %v832_v31, 16  ;;  %v2236_v46 = vld [vmem:[%s3073_s24 + $0x6c] sm:$0xff]  }
 0x11b   : > { %v1750_v39 = vpop.f32.mrf.mxu3  ;;  %v1654_v63 = vpop.f32.mrf.mxu1 }
 0x11c   : > { %v1751_v44 = vadd.f32 %v1750_v39, %v1702_v38  ;;  %v1655_v22 = vadd.f32 %v1654_v63, %v3456_v29  ;;  %v747_v29 = vsel %vm497_vm1, %v745_v27, %v746_v37  ;;  %v2850_v38 = vld [vmem:[%s3073_s24 + $0x6c] sm:$0xf0]  ;;  %v748_v39 = vrot.slane %v2849_v15, 1 }
 0x11d   : > { %v1801_v34 = vpop.f32.mrf.mxu0  ;;  %v916_v41 = vrot.slane %v914_v19, 1 }
 0x11e   : > { %v3589_v60 = vadd.f32 %v1799_v24, %v1751_v44  ;;  %v2715_v24 = vld [vmem:[%s3073_s24 + $0x60] sm:$0xe]  ;;  %v981_v44 = vrot.slane %v832_v31, 1  ;;  %v2852_v31 = vor.u32 %v2851_v4, %v2850_v38 }
 0x11f   : > { %v2716_v33 = vor.u32 %v2715_v24, %v2714_v18  ;;  %v917_v27 = vsel %vm368_vm0, %v3452_v14, %v916_v41  ;;  %v752_v24 = vrot.slane %v3436_v61, 1 }
 0x120   : > { %v983_v15 = vrot.slane %v2852_v31, 1 }
 0x121   : > { %v1703_v48 = vpop.f32.mrf.mxu2  ;;  %v980_v42 = vrot.slane %v2716_v33, 1 }
 0x122   : > { %v1704_v62 = vadd.f32 %v1703_v48, %v1655_v22  ;;  %v2245_v22 = vld [vmem:[%s3073_s24 + $0x74] sm:$0x1]  ;;  %v921_v48 = vshll.u32 %v2236_v46, 16 }
 0x123   : > { %v1752_v2 = vpop.f32.mrf.mxu3  ;;  %v1657_v6 = vpop.f32.mrf.mxu1  ;;  %v982_v57 = vsel %vm497_vm1, %v980_v42, %v981_v44  ;;  %v825_v59 = vunpack.c.l.b16 %v2245_v22 }
 0x124   : > { %v1753_v7 = vadd.f32 %v1752_v2, %v1704_v62  ;;  %v1658_v28 = vadd.f32 %v1657_v6, %v3475_v43  ;;  %v2702_v62 = vld [vmem:[%s3073_s24 + $0x60] sm:$0xf0]  ;;  %v2703_v2 = vld [vmem:[%s3073_s24 + $0x60] sm:$0xe]  ;;  %s185_s24 = sand.u32 1, %s2923_s13  }
 0x125   : > { %v1804_v55 = vpop.f32.mrf.mxu0  ;;  %v833_v6 = vpack.c.b16 %v825_v59, %v825_v59  ;;  %v2704_v3 = vor.u32 %v2703_v2, %v2702_v62  ;;  %s2188_s27 = sshll.u32 %s185_s24, 7  ;;  %s2080_s10 = scalar_lea.sflag [#allocation3], %s185_s24 }
 0x126   : > { %1852 = vmatmul.bf16.gmra.mxu1 %v747_v29  ;;  %1901 = vmatmul.bf16.gmra.mxu2 %v3570_v25  ;;  %v3599_v16 = vadd.f32 %v1801_v34, %v1753_v7  ;;  %v919_v7 = vshrl.u32 %v2236_v46, 16  ;;  %s3642_s28 = scalar_lea.vmem [#allocation2], %s2188_s27 }
 0x127   : > { %v751_v18 = vrot.slane %v2704_v3, 1  ;;  %s2095_s8 = sshll.u32 %s3642_s28, 4  ;;  %s2096_s8 = int_to_ptr.vmem [resolvable:$true] %s2095_s8 }
 0x128   : > { %1950 = vmatmul.bf16.gmra.mxu3 %v905_v54  ;;  %1999 = vmatmul.bf16.gmra.mxu0 %v979_v12 }
 0x129   : > { %v1706_v10 = vpop.f32.mrf.mxu2  ;;  %v753_v33 = vsel %vm497_vm1, %v751_v18, %v752_v24 }
 0x12a   : > { %v1707_v17 = vadd.f32 %v1706_v10, %v1658_v28  ;;  %v923_v28 = vrot.slane %v921_v48, 1 }
 0x12b   : > { %v1755_v43 = vpop.f32.mrf.mxu3  ;;  %v1659_v51 = vpop.f32.mrf.mxu1 }
 0x12c   : > { %v1756_v13 = vadd.f32 %v1755_v43, %v1707_v17  ;;  %v1660_v25 = vadd.f32 %v1659_v51, %v3494_v8  ;;  %v750_v8 = vsel %vm497_vm1, %v748_v39, %v749_v40  ;;  %v924_v17 = vor.u32 %v923_v28, %v919_v7 }
 0x12d   : > { %v1806_v49 = vpop.f32.mrf.mxu0  ;;  %v984_v51 = vrot.slane %v833_v6, 1 }
 0x12e   : > { %v3607_v63 = vadd.f32 %v1804_v55, %v1756_v13 }
 0x12f   : > { %v985_v41 = vsel %vm497_vm1, %v983_v15, %v984_v51 }
 0x131   : > { %v1708_v1 = vpop.f32.mrf.mxu2 }
 0x132   : > { %v1709_v34 = vadd.f32 %v1708_v1, %v1660_v25 }
 0x133   : > { %v1757_v52 = vpop.f32.mrf.mxu3  ;;  %v1662_v35 = vpop.f32.mrf.mxu1 }
 0x134   : > { %v1758_v37 = vadd.f32 %v1757_v52, %v1709_v34  ;;  %v1663_v53 = vadd.f32 %v1662_v35, %v3443_v26 }
 0x135   : > { %v1809_v20 = vpop.f32.mrf.mxu0 }
 0x136   : > { %1857 = vmatmul.bf16.gmra.mxu1 %v750_v8  ;;  %1906 = vmatmul.bf16.gmra.mxu2 %v3427_v56  ;;  %v3618_v5 = vadd.f32 %v1806_v49, %v1758_v37  ;;  %v926_v56 = vshll.u32 %v833_v6, 16 }
 0x138   : > { %1955 = vmatmul.bf16.gmra.mxu3 %v917_v27  ;;  %2004 = vmatmul.bf16.gmra.mxu0 %v982_v57  ;;  %v928_v43 = vrot.slane %v926_v56, 1 }
 0x139   : > { %v1711_v14 = vpop.f32.mrf.mxu2 }
 0x13a   : > { %v1712_v29 = vadd.f32 %v1711_v14, %v1663_v53  ;;  %v929_v38 = vsel %vm368_vm0, %v924_v17, %v928_v43 }
 0x13b   : > { %v1760_v58 = vpop.f32.mrf.mxu3  ;;  %v1664_v26 = vpop.f32.mrf.mxu1 }
 0x13c   : > { %v1761_v55 = vadd.f32 %v1760_v58, %v1712_v29  ;;  %v1665_v54 = vadd.f32 %v1664_v26, %v3459_v11 }
 0x13d   : > { %v1811_v12 = vpop.f32.mrf.mxu0 }
 0x13e   : > { %v3623_v10 = vadd.f32 %v1809_v20, %v1761_v55 }
 0x141   : > { %v1713_v19 = vpop.f32.mrf.mxu2 }
 0x142   : > { %v1714_v13 = vadd.f32 %v1713_v19, %v1665_v54 }
 0x143   : > { %v1762_v25 = vpop.f32.mrf.mxu3  ;;  %v1667_v49 = vpop.f32.mrf.mxu1 }
 0x144   : > { %v1763_v39 = vadd.f32 %v1762_v25, %v1714_v13  ;;  %v1668_v11 = vadd.f32 %v1667_v49, %v3479_v47 }
 0x145   : > { %v1814_v40 = vpop.f32.mrf.mxu0 }
 0x146   : > { %1862 = vmatmul.bf16.gmra.mxu1 %v753_v33  ;;  %1911 = vmatmul.bf16.gmra.mxu2 %v2236_v46  ;;  %v3630_v61 = vadd.f32 %v1811_v12, %v1763_v39 }
 0x148   : > { %1960 = vmatmul.bf16.gmra.mxu3 %v929_v38  ;;  %2009 = vmatmul.bf16.gmra.mxu0 %v985_v41 }
 0x149   : > { %v1716_v42 = vpop.f32.mrf.mxu2 }
 0x14a   : > { %v1717_v44 = vadd.f32 %v1716_v42, %v1668_v11 }
 0x14b   : > { %v1765_v1 = vpop.f32.mrf.mxu3  ;;  %v1669_v22 = vpop.f32.mrf.mxu1 }
 0x14c   : > { %v1766_v34 = vadd.f32 %v1765_v1, %v1717_v44  ;;  %v1670_v52 = vadd.f32 %v1669_v22, %v3497_v9 }
 0x14d   : > { %v1816_v47 = vpop.f32.mrf.mxu0 }
 0x14e   : > { %v3633_v35 = vadd.f32 %v1814_v40, %v1766_v34 }
 0x151   : > { %v1718_v8 = vpop.f32.mrf.mxu2 }
 0x152   : > { %v1719_v27 = vadd.f32 %v1718_v8, %v1670_v52 }
 0x153   : > { %v1767_v37 = vpop.f32.mrf.mxu3  ;;  %v1828_v46 = vpop.f32.mrf.mxu1 }
 0x154   : > { %v1768_v53 = vadd.f32 %v1767_v37, %v1719_v27  ;;  %v1829_v59 = vadd.f32 %v1828_v46, %v3509_v0 }
 0x155   : > { %v1975_v20 = vpop.f32.mrf.mxu0 }
 0x156   : > { %v3635_v57 = vadd.f32 %v1816_v47, %v1768_v53 }
 0x159   : > { %v1877_v4 = vpop.f32.mrf.mxu2 }
 0x15a   : > { %v1878_v48 = vadd.f32 %v1877_v4, %v1829_v59 }
 0x15b   : > { %v1926_v62 = vpop.f32.mrf.mxu3  ;;  %v1830_v2 = vpop.f32.mrf.mxu1 }
 0x15c   : > { %v1927_v9 = vadd.f32 %v1926_v62, %v1878_v48  ;;  %v1831_v58 = vadd.f32 %v1830_v2, %v3521_v32 }
 0x15d   : > { %v1977_v6 = vpop.f32.mrf.mxu0 }
 0x15e   : > { %v1976_v14 = vadd.f32 %v1975_v20, %v1927_v9 }
 0x160   : > { %vm2015_vm2 = vcmp.gt.f32.partialorder %v1976_v14, 0.0  ;;  %v2031_v29 = vmul.f32 0.1, %v1976_v14 }
 0x161   : > { %v1879_v26 = vpop.f32.mrf.mxu2 }
 0x162   : > { %v2047_v3 = vsel %vm2015_vm2, %v1976_v14, %v2031_v29  ;;  %v1880_v7 = vadd.f32 %v1879_v26, %v1831_v58 }
 0x163   : > { %v1928_v28 = vpop.f32.mrf.mxu3  ;;  %2063 = vst [vmem:[%s3642_s28] sm:$0xff] %v2047_v3  ;;  %v1833_v0 = vpop.f32.mrf.mxu1 }
 0x164   : > { %v1929_v55 = vadd.f32 %v1928_v28, %v1880_v7  ;;  %v1834_v31 = vadd.f32 %v1833_v0, %v3533_v50 }
 0x165   : > { %v1980_v54 = vpop.f32.mrf.mxu0 }
 0x166   : > { %v1978_v12 = vadd.f32 %v1977_v6, %v1929_v55 }
 0x168   : > { %vm2016_vm3 = vcmp.gt.f32.partialorder %v1978_v12, 0.0  ;;  %v2032_v56 = vmul.f32 0.1, %v1978_v12 }
 0x169   : > { %v1882_v18 = vpop.f32.mrf.mxu2 }
 0x16a   : > { %v2048_v32 = vsel %vm2016_vm3, %v1978_v12, %v2032_v56  ;;  %v1883_v24 = vadd.f32 %v1882_v18, %v1834_v31 }
 0x16b   : > { %v1931_v17 = vpop.f32.mrf.mxu3  ;;  %2064 = vst [vmem:[%s3642_s28 + $0x8] sm:$0xff] %v2048_v32  ;;  %v1835_v43 = vpop.f32.mrf.mxu1 }
 0x16c   : > { %v1932_v15 = vadd.f32 %v1931_v17, %v1883_v24  ;;  %v1836_v25 = vadd.f32 %v1835_v43, %v3542_v36 }
 0x16d   : > { %v1982_v51 = vpop.f32.mrf.mxu0 }
 0x16e   : > { %v1981_v19 = vadd.f32 %v1980_v54, %v1932_v15 }
 0x170   : > { %vm2017_vm4 = vcmp.gt.f32.partialorder %v1981_v19, 0.0  ;;  %v2033_v13 = vmul.f32 0.1, %v1981_v19 }
 0x171   : > { %v1884_v49 = vpop.f32.mrf.mxu2 }
 0x172   : > { %v2049_v33 = vsel %vm2017_vm4, %v1981_v19, %v2033_v13  ;;  %v1885_v39 = vadd.f32 %v1884_v49, %v1836_v25 }
 0x173   : > { %v1933_v11 = vpop.f32.mrf.mxu3  ;;  %2065 = vst [vmem:[%s3642_s28 + $0x10] sm:$0xff] %v2049_v33  ;;  %v1838_v50 = vpop.f32.mrf.mxu1 }
 0x174   : > { %v1934_v40 = vadd.f32 %v1933_v11, %v1885_v39  ;;  %v1839_v44 = vadd.f32 %v1838_v50, %v3550_v23 }
 0x175   : > { %v1985_v38 = vpop.f32.mrf.mxu0 }
 0x176   : > { %v1983_v41 = vadd.f32 %v1982_v51, %v1934_v40 }
 0x178   : > { %vm2018_vm5 = vcmp.gt.f32.partialorder %v1983_v41, 0.0  ;;  %v2034_v42 = vmul.f32 0.1, %v1983_v41 }
 0x179   : > { %v1887_v1 = vpop.f32.mrf.mxu2 }
 0x17a   : > { %v2050_v22 = vsel %vm2018_vm5, %v1983_v41, %v2034_v42  ;;  %v1888_v34 = vadd.f32 %v1887_v1, %v1839_v44 }
 0x17b   : > { %v1936_v52 = vpop.f32.mrf.mxu3  ;;  %2066 = vst [vmem:[%s3642_s28 + $0x18] sm:$0xff] %v2050_v22  ;;  %v1840_v36 = vpop.f32.mrf.mxu1 }
 0x17c   : > { %v1937_v47 = vadd.f32 %v1936_v52, %v1888_v34  ;;  %v1841_v46 = vadd.f32 %v1840_v36, %v3562_v21 }
 0x17d   : > { %v1987_v8 = vpop.f32.mrf.mxu0 }
 0x17e   : > { %v1986_v27 = vadd.f32 %v1985_v38, %v1937_v47 }
 0x180   : > { %vm2019_vm6 = vcmp.gt.f32.partialorder %v1986_v27, 0.0  ;;  %v2035_v37 = vmul.f32 0.1, %v1986_v27 }
 0x181   : > { %v1889_v53 = vpop.f32.mrf.mxu2 }
 0x182   : > { %v2051_v20 = vsel %vm2019_vm6, %v1986_v27, %v2035_v37  ;;  %v1890_v59 = vadd.f32 %v1889_v53, %v1841_v46 }
 0x183   : > { %v1938_v4 = vpop.f32.mrf.mxu3  ;;  %2067 = vst [vmem:[%s3642_s28 + $0x20] sm:$0xff] %v2051_v20  ;;  %v1843_v23 = vpop.f32.mrf.mxu1 }
 0x184   : > { %v1939_v48 = vadd.f32 %v1938_v4, %v1890_v59  ;;  %v1844_v6 = vadd.f32 %v1843_v23, %v3574_v30 }
 0x185   : > { %v1990_v62 = vpop.f32.mrf.mxu0 }
 0x186   : > { %v1988_v2 = vadd.f32 %v1987_v8, %v1939_v48 }
 0x188   : > { %vm2020_vm7 = vcmp.gt.f32.partialorder %v1988_v2, 0.0  ;;  %v2036_v9 = vmul.f32 0.1, %v1988_v2 }
 0x189   : > { %v1892_v14 = vpop.f32.mrf.mxu2 }
 0x18a   : > { %v2052_v29 = vsel %vm2020_vm7, %v1988_v2, %v2036_v9  ;;  %v1893_v58 = vadd.f32 %v1892_v14, %v1844_v6 }
 0x18b   : > { %v1941_v26 = vpop.f32.mrf.mxu3  ;;  %2068 = vst [vmem:[%s3642_s28 + $0x28] sm:$0xff] %v2052_v29  ;;  %v1845_v21 = vpop.f32.mrf.mxu1 }
 0x18c   : > { %v1942_v3 = vadd.f32 %v1941_v26, %v1893_v58  ;;  %v1846_v55 = vadd.f32 %v1845_v21, %v3582_v45 }
 0x18d   : > { %v1992_v7 = vpop.f32.mrf.mxu0 }
 0x18e   : > { %v1991_v28 = vadd.f32 %v1990_v62, %v1942_v3 }
 0x190   : > { %vm2021_vm8 = vcmp.gt.f32.partialorder %v1991_v28, 0.0  ;;  %v2037_v0 = vmul.f32 0.1, %v1991_v28 }
 0x191   : > { %v1894_v54 = vpop.f32.mrf.mxu2 }
 0x192   : > { %v2053_v12 = vsel %vm2021_vm8, %v1991_v28, %v2037_v0  ;;  %v1895_v56 = vadd.f32 %v1894_v54, %v1846_v55 }
 0x193   : > { %v1943_v31 = vpop.f32.mrf.mxu3  ;;  %2069 = vst [vmem:[%s3642_s28 + $0x30] sm:$0xff] %v2053_v12  ;;  %v1848_v30 = vpop.f32.mrf.mxu1 }
 0x194   : > { %v1944_v18 = vadd.f32 %v1943_v31, %v1895_v56  ;;  %v1849_v43 = vadd.f32 %v1848_v30, %v3589_v60 }
 0x195   : > { %v1995_v32 = vpop.f32.mrf.mxu0 }
 0x196   : > { %v1993_v24 = vadd.f32 %v1992_v7, %v1944_v18 }
 0x198   : > { %vm2022_vm9 = vcmp.gt.f32.partialorder %v1993_v24, 0.0  ;;  %v2038_v17 = vmul.f32 0.1, %v1993_v24 }
 0x199   : > { %v1897_v15 = vpop.f32.mrf.mxu2 }
 0x19a   : > { %v2054_v51 = vsel %vm2022_vm9, %v1993_v24, %v2038_v17  ;;  %v1898_v19 = vadd.f32 %v1897_v15, %v1849_v43 }
 0x19b   : > { %v1946_v13 = vpop.f32.mrf.mxu3  ;;  %2070 = vst [vmem:[%s3642_s28 + $0x38] sm:$0xff] %v2054_v51  ;;  %v1850_v45 = vpop.f32.mrf.mxu1 }
 0x19c   : > { %v1947_v25 = vadd.f32 %v1946_v13, %v1898_v19  ;;  %v1851_v11 = vadd.f32 %v1850_v45, %v3599_v16 }
 0x19d   : > { %v1997_v49 = vpop.f32.mrf.mxu0 }
 0x19e   : > { %v1996_v33 = vadd.f32 %v1995_v32, %v1947_v25 }
 0x1a0   : > { %vm2023_vm10 = vcmp.gt.f32.partialorder %v1996_v33, 0.0  ;;  %v2039_v39 = vmul.f32 0.1, %v1996_v33 }
 0x1a1   : > { %v1899_v50 = vpop.f32.mrf.mxu2 }
 0x1a2   : > { %v2055_v40 = vsel %vm2023_vm10, %v1996_v33, %v2039_v39  ;;  %v1900_v38 = vadd.f32 %v1899_v50, %v1851_v11 }
 0x1a3   : > { %v1948_v41 = vpop.f32.mrf.mxu3  ;;  %2071 = vst [vmem:[%s3642_s28 + $0x40] sm:$0xff] %v2055_v40  ;;  %v1853_v60 = vpop.f32.mrf.mxu1 }
 0x1a4   : > { %v1949_v42 = vadd.f32 %v1948_v41, %v1900_v38  ;;  %v1854_v34 = vadd.f32 %v1853_v60, %v3607_v63 }
 0x1a5   : > { %v2000_v44 = vpop.f32.mrf.mxu0 }
 0x1a6   : > { %v1998_v1 = vadd.f32 %v1997_v49, %v1949_v42 }
 0x1a8   : > { %vm2024_vm11 = vcmp.gt.f32.partialorder %v1998_v1, 0.0  ;;  %v2040_v22 = vmul.f32 0.1, %v1998_v1 }
 0x1a9   : > { %v1902_v52 = vpop.f32.mrf.mxu2 }
 0x1aa   : > { %v2056_v36 = vsel %vm2024_vm11, %v1998_v1, %v2040_v22  ;;  %v1903_v47 = vadd.f32 %v1902_v52, %v1854_v34 }
 0x1ab   : > { %v1951_v8 = vpop.f32.mrf.mxu3  ;;  %2072 = vst [vmem:[%s3642_s28 + $0x48] sm:$0xff] %v2056_v36  ;;  %v1855_v16 = vpop.f32.mrf.mxu1 }
 0x1ac   : > { %v1952_v27 = vadd.f32 %v1951_v8, %v1903_v47  ;;  %v1856_v20 = vadd.f32 %v1855_v16, %v3618_v5 }
 0x1ad   : > { %v2002_v37 = vpop.f32.mrf.mxu0 }
 0x1ae   : > { %v2001_v46 = vadd.f32 %v2000_v44, %v1952_v27 }
 0x1b0   : > { %vm2025_vm12 = vcmp.gt.f32.partialorder %v2001_v46, 0.0  ;;  %v2041_v53 = vmul.f32 0.1, %v2001_v46 }
 0x1b1   : > { %v1904_v59 = vpop.f32.mrf.mxu2 }
 0x1b2   : > { %v2057_v4 = vsel %vm2025_vm12, %v2001_v46, %v2041_v53  ;;  %v1905_v23 = vadd.f32 %v1904_v59, %v1856_v20 }
 0x1b3   : > { %v1953_v48 = vpop.f32.mrf.mxu3  ;;  %2073 = vst [vmem:[%s3642_s28 + $0x50] sm:$0xff] %v2057_v4  ;;  %v1858_v63 = vpop.f32.mrf.mxu1 }
 0x1b4   : > { %v1954_v62 = vadd.f32 %v1953_v48, %v1905_v23  ;;  %v1859_v14 = vadd.f32 %v1858_v63, %v3623_v10 }
 0x1b5   : > { %v2005_v9 = vpop.f32.mrf.mxu0 }
 0x1b6   : > { %v2003_v2 = vadd.f32 %v2002_v37, %v1954_v62 }
 0x1b8   : > { %vm2026_vm13 = vcmp.gt.f32.partialorder %v2003_v2, 0.0  ;;  %v2042_v6 = vmul.f32 0.1, %v2003_v2 }
 0x1b9   : > { %v1907_v29 = vpop.f32.mrf.mxu2 }
 0x1ba   : > { %v2058_v58 = vsel %vm2026_vm13, %v2003_v2, %v2042_v6  ;;  %v1908_v26 = vadd.f32 %v1907_v29, %v1859_v14 }
 0x1bb   : > { %v1956_v21 = vpop.f32.mrf.mxu3  ;;  %2074 = vst [vmem:[%s3642_s28 + $0x58] sm:$0xff] %v2058_v58  ;;  %v1860_v5 = vpop.f32.mrf.mxu1 }
 0x1bc   : > { %v1957_v3 = vadd.f32 %v1956_v21, %v1908_v26  ;;  %v1861_v0 = vadd.f32 %v1860_v5, %v3630_v61 }
 0x1bd   : > { %v2007_v55 = vpop.f32.mrf.mxu0 }
 0x1be   : > { %v2006_v7 = vadd.f32 %v2005_v9, %v1957_v3 }
 0x1c0   : > { %vm2027_vm14 = vcmp.gt.f32.partialorder %v2006_v7, 0.0  ;;  %v2043_v28 = vmul.f32 0.1, %v2006_v7 }
 0x1c1   : > { %v1909_v54 = vpop.f32.mrf.mxu2 }
 0x1c2   : > { %v2059_v12 = vsel %vm2027_vm14, %v2006_v7, %v2043_v28  ;;  %v1910_v10 = vadd.f32 %v1909_v54, %v1861_v0 }
 0x1c3   : > { %v1958_v56 = vpop.f32.mrf.mxu3  ;;  %2075 = vst [vmem:[%s3642_s28 + $0x60] sm:$0xff] %v2059_v12  ;;  %v1863_v31 = vpop.f32.mrf.mxu1 }
 0x1c4   : > { %v1959_v30 = vadd.f32 %v1958_v56, %v1910_v10  ;;  %v1864_v24 = vadd.f32 %v1863_v31, %v3633_v35 }
 0x1c5   : > { %v2010_v51 = vpop.f32.mrf.mxu0 }
 0x1c6   : > { %v2008_v18 = vadd.f32 %v2007_v55, %v1959_v30 }
 0x1c8   : > { %vm2028_vm15 = vcmp.gt.f32.partialorder %v2008_v18, 0.0  ;;  %v2044_v32 = vmul.f32 0.1, %v2008_v18 }
 0x1c9   : > { %v1912_v17 = vpop.f32.mrf.mxu2 }
 0x1ca   : > { %v2060_v43 = vsel %vm2028_vm15, %v2008_v18, %v2044_v32  ;;  %v1913_v15 = vadd.f32 %v1912_v17, %v1864_v24 }
 0x1cb   : > { %v1961_v61 = vpop.f32.mrf.mxu3  ;;  %2076 = vst [vmem:[%s3642_s28 + $0x68] sm:$0xff] %v2060_v43  ;;  %v1865_v13 = vpop.f32.mrf.mxu1 }
 0x1cc   : > { %v1962_v19 = vadd.f32 %v1961_v61, %v1913_v15  ;;  %v1866_v49 = vadd.f32 %v1865_v13, %v3635_v57 }
 0x1cd   : > { %v2012_v40 = vpop.f32.mrf.mxu0 }
 0x1ce   : > { %v2011_v45 = vadd.f32 %v2010_v51, %v1962_v19 }
 0x1d0   : > { %vm2029_vm0 = vcmp.gt.f32.partialorder %v2011_v45, 0.0  ;;  %v2045_v25 = vmul.f32 0.1, %v2011_v45 }
 0x1d1   : > { %v1914_v35 = vpop.f32.mrf.mxu2 }
 0x1d2   : > { %v2061_v33 = vsel %vm2029_vm0, %v2011_v45, %v2045_v25  ;;  %v1915_v39 = vadd.f32 %v1914_v35, %v1866_v49 }
 0x1d3   : > { %2077 = vst [vmem:[%s3642_s28 + $0x70] sm:$0xff] %v2061_v33  ;;  %v1963_v11 = vpop.f32.mrf.mxu3 }
 0x1d4   : > { %v1964_v50 = vadd.f32 %v1963_v11, %v1915_v39 }
 0x1d6   : > { %v2013_v38 = vadd.f32 %v2012_v40, %v1964_v50 }
 0x1d8   : > { %vm2030_vm1 = vcmp.gt.f32.partialorder %v2013_v38, 0.0  ;;  %v2046_v41 = vmul.f32 0.1, %v2013_v38 }
 0x1da   : > { %v2062_v57 = vsel %vm2030_vm1, %v2013_v38, %v2046_v41 }
 0x1db   : > { %2078 = vst [vmem:[%s3642_s28 + $0x78] sm:$0xff] %v2062_v57 }
 0x1dc   : > { %2880 = shalt.err (!%p2877_p7)
}
 0x1dd   : > { %s2949_s24 = smov 128   ;;  %s2950_s28 = smov 8  }
 0x1de   : > { %2743 = dma.vmem_to_hbm [thread:$0]  (%p3022_p3), %s2096_s8, 2048, %s2098_s9, %s2080_s10, %s2949_s24, %s2949_s24, %s2950_s28  }
 0x1df PF: > { %p2749_p9 = scmp.ge.s32.totalorder %s2947_s19, 2  ;;  %s2112_s6 = sand.u32 1, %s2919_s12  }
 0x1e0   : > { %s2113_s15 = scalar_lea.sflag [#allocation3], %s2112_s6 }
 0x1e1   : > { %p2746_p10 = pnand %p2749_p9, %p3031_p8 }
 0x1e3   : > { %p2747_p11 = pneg %p2746_p10 }
 0x1e5   : > { %2914 = dma.done.wait (%p2747_p11), %s2113_s15, 2048  }
 0x1e6   : > { %2916 = vsyncadd (%p2747_p11), %s2113_s15, 4294965248  ;;  %s16_s19 = sadd.s32 1, %s2947_s19   ;;  %s3726_s12 = smov %s2923_s13 }
 0x1e7   : > { %p13_p12 = scmp.ge.s32.totalorder %s16_s19, 6   ;;  %s3727_s13 = smov %s2927_s14 }
 0x1e8   : > { %s3728_s14 = smov %s3040_s30  ;;  %s3729_s15 = smov %s2939_s17 }
 0x1e9   : > { %s3730_s16 = smov %s2943_s18  ;;  %s3731_s17 = smov %s3734_s22 }
 0x1ea   : > { %s3732_s18 = smov %s3738_s23  ;;  %15 = sbr.rel (!%p13_p12) target bundleno = 5 (0x5), region = 69 }
 0x1ef   :  { %2119 = vsyncpa [#allocation3], 1 }
 0x1f0   :  { %2121 = vsyncpa [#allocation3 + $0x1], 1 }

</bundles_post_ra>
